<compile_context>
chip_gen: v7x
topology: tpu7x:2x2x1
jax: 0.10.0
libtpu: 0.0.40
codegen_flags: <defaults>
</compile_context>

<pallas_src>
import functools
from collections import namedtuple

import jax
import jax.numpy as jnp
from jax.experimental import pallas as pl
from jax.experimental.pallas import tpu as pltpu


# ----------------------------------------------------------------------------
# Tiling / budget helpers
# ----------------------------------------------------------------------------
def _pick_tile(dim, cap, align):
    """Largest tile <= cap that divides dim and is a multiple of `align`;
    falls back to the full dim (always a legal BlockSpec)."""
    if dim <= cap:
        return dim
    t = (cap // align) * align
    while t >= align:
        if dim % t == 0:
            return t
        t -= align
    return dim


def _vmem_limit(needed_bytes):
    """Scoped-VMEM budget: actual block bytes + 25% + 4 MiB headroom,
    floored at 32 MiB, capped below physical VMEM of any generation."""
    if needed_bytes > (120 << 20):
        raise ValueError(
            f"Pallas block working set ({needed_bytes >> 20} MiB) exceeds TPU "
            "VMEM; reduce tile sizes / sequence length.")
    return int(min(max(needed_bytes * 1.25 + (4 << 20), 32 << 20), 96 << 20))


def _exp_dtype_for_device():
    """bf16 exp on v6e/v7x (bf16 EUP ~2x throughput); f32 elsewhere (v5e)."""
    try:
        kind = jax.devices()[0].device_kind.lower()
    except Exception:  # pragma: no cover
        kind = ""
    return jnp.bfloat16 if ("v6" in kind or "v7" in kind) else jnp.float32


# ----------------------------------------------------------------------------
# Fused tiled matmul: optional RMSNorm on the input tile (cached across N
# tiles), optional ReLU, optional fused residual add.  f32 accumulation.
# ----------------------------------------------------------------------------
def _make_matmul_kernel(has_ln, has_res, activation):
    def kernel(*refs):
        idx = 0
        x_ref = refs[idx]; idx += 1
        w_ref = refs[idx]; idx += 1
        ln_ref = None
        res_ref = None
        if has_ln:
            ln_ref = refs[idx]; idx += 1
        if has_res:
            res_ref = refs[idx]; idx += 1
        o_ref = refs[idx]; idx += 1
        acc_ref = refs[idx]; idx += 1
        xn_ref = refs[idx] if has_ln else None

        j = pl.program_id(1)
        k_step = pl.program_id(2)

        @pl.when(k_step == 0)
        def _():
            acc_ref[...] = jnp.zeros_like(acc_ref)

        if has_ln:
            # tk == K on the LN path, so k_step == 0 always.  Normalize the
            # (tm, K) tile once per M tile (j == 0) into a bf16 VMEM scratch
            # and reuse it for every N tile -> no redundant VPU work / spills.
            @pl.when(j == 0)
            def _():
                xf = x_ref[...].astype(jnp.float32)
                var = jnp.mean(xf * xf, axis=-1, keepdims=True)
                xf = xf * jax.lax.rsqrt(var + 1e-6)
                xf = xf * ln_ref[...].astype(jnp.float32)
                xn_ref[...] = xf.astype(xn_ref.dtype)

            x = xn_ref[...]
        else:
            x = x_ref[...]

        acc_ref[...] += jnp.dot(x, w_ref[...], preferred_element_type=jnp.float32)

        @pl.when(k_step == pl.num_programs(2) - 1)
        def _():
            y = acc_ref[...]
            if activation == "relu":
                y = jnp.maximum(y, 0.0)
            if has_res:
                y = y + res_ref[...].astype(jnp.float32)
            o_ref[...] = y.astype(o_ref.dtype)

    return kernel


def fused_matmul(x, w, *, ln=None, residual=None, activation=None,
                 out_dtype=None, tm_cap=256, tn_cap=512, tk_cap=1024):
    """x: (M, K) @ w: (K, N) -> (M, N) with optional fused RMSNorm(x)*ln,
    ReLU, and residual add.  bf16 operands, f32 accumulation."""
    M, K = x.shape
    K2, N = w.shape
    assert K == K2
    out_dtype = out_dtype or x.dtype

    has_ln = ln is not None
    has_res = residual is not None

    # RMSNorm needs the full reduction axis in one tile.
    tk = K if has_ln else _pick_tile(K, tk_cap, 128)
    tm = _pick_tile(M, tm_cap, 16)          # 16: bf16 packs two rows/sublane
    tn = _pick_tile(N, tn_cap, 128)
    grid = (M // tm, N // tn, K // tk)

    in_specs = [
        pl.BlockSpec((tm, tk), lambda i, j, k: (i, k)),
        pl.BlockSpec((tk, tn), lambda i, j, k: (k, j)),
    ]
    inputs = [x, w]
    if has_ln:
        in_specs.append(pl.BlockSpec((1, tk), lambda i, j, k: (0, k)))
        inputs.append(ln)
    if has_res:
        in_specs.append(pl.BlockSpec((tm, tn), lambda i, j, k: (i, j)))
        inputs.append(residual)

    scratch = [pltpu.VMEM((tm, tn), jnp.float32)]
    if has_ln:
        scratch.append(pltpu.VMEM((tm, tk), x.dtype))   # cached normalized x

    kernel = _make_matmul_kernel(has_ln, has_res, activation)

    xb, wb, ob = x.dtype.itemsize, w.dtype.itemsize, jnp.dtype(out_dtype).itemsize

    # VMEM budget from actual block bytes (double-buffered inputs/outputs).
    needed = (2 * tm * tk * xb + 2 * tk * tn * wb
              + 2 * tm * tn * ob + tm * tn * 4)
    if has_ln:
        needed += 2 * tk * 4 + tm * tk * xb
    if has_res:
        needed += 2 * tm * tn * residual.dtype.itemsize

    # Cost estimate counts re-streamed operands (x read N/tn times, w M/tm times).
    flops = 2 * M * N * K
    bytes_accessed = (M * K * xb * (N // tn)
                      + K * N * wb * (M // tm)
                      + M * N * ob)
    if has_res:
        bytes_accessed += M * N * residual.dtype.itemsize

    # The j==0 RMSNorm cache requires the N axis to stay on one core.
    if has_ln:
        dims = ("parallel", "arbitrary", "arbitrary")
    else:
        dims = ("parallel", "parallel", "arbitrary")

    return pl.pallas_call(
        kernel,
        out_shape=jax.ShapeDtypeStruct((M, N), out_dtype),
        grid=grid,
        in_specs=in_specs,
        out_specs=pl.BlockSpec((tm, tn), lambda i, j, k: (i, j)),
        scratch_shapes=scratch,
        compiler_params=pltpu.CompilerParams(
            dimension_semantics=dims,
            vmem_limit_bytes=_vmem_limit(needed)),
        cost_estimate=pl.CostEstimate(
            flops=flops, transcendentals=0, bytes_accessed=bytes_accessed),
    )(*inputs)


# ----------------------------------------------------------------------------
# Standalone tiled RMSNorm (only used for the final encoder LayerNorm)
# ----------------------------------------------------------------------------
def _rmsnorm_kernel(x_ref, w_ref, o_ref):
    x = x_ref[...].astype(jnp.float32)
    var = jnp.mean(x * x, axis=-1, keepdims=True)
    y = x * jax.lax.rsqrt(var + 1e-6) * w_ref[...].astype(jnp.float32)
    o_ref[...] = y.astype(o_ref.dtype)


def pallas_rmsnorm(x, w, *, out_dtype=None, tm_cap=1024):
    M, D = x.shape
    out_dtype = out_dtype or x.dtype
    tm = _pick_tile(M, tm_cap, 16)
    ob = jnp.dtype(out_dtype).itemsize
    needed = 2 * tm * D * x.dtype.itemsize + 2 * tm * D * ob + 2 * D * 4
    return pl.pallas_call(
        _rmsnorm_kernel,
        out_shape=jax.ShapeDtypeStruct((M, D), out_dtype),
        grid=(M // tm,),
        in_specs=[pl.BlockSpec((tm, D), lambda i: (i, 0)),
                  pl.BlockSpec((1, D), lambda i: (0, 0))],
        out_specs=pl.BlockSpec((tm, D), lambda i: (i, 0)),
        compiler_params=pltpu.CompilerParams(
            dimension_semantics=("parallel",),
            vmem_limit_bytes=_vmem_limit(needed)),
        cost_estimate=pl.CostEstimate(
            flops=3 * M * D, transcendentals=M,
            bytes_accessed=M * D * (x.dtype.itemsize + ob)),
    )(x, w)


# ----------------------------------------------------------------------------
# Attention: one (batch*context) row per grid step; the fused (S, 3D) QKV
# block is consumed directly and heads are split with static lane offsets.
# Per-head outputs are stored incrementally into the (S, D) output block.
# Bias = pos_bias[h] (bf16, constant block index -> fetched from HBM once)
# + per-row mask bias, combined in-kernel (never materialized in HBM).
# ----------------------------------------------------------------------------
def _make_attention_kernel(H, Dh, D, exp_dtype):
    def kernel(qkv_ref, bias_ref, mask_ref, o_ref):
        mask_bias = mask_ref[0].astype(jnp.float32)        # (1, S), keys axis

        for h in range(H):                                 # static unrolled
            lo = h * Dh
            # Per-head slices straight from the VMEM ref (static lane offsets):
            # keeps only (S, Dh) live per operand instead of the whole (S, 3D).
            q = qkv_ref[0, :, lo:lo + Dh]
            k = qkv_ref[0, :, D + lo:D + lo + Dh]
            v = qkv_ref[0, :, 2 * D + lo:2 * D + lo + Dh]

            # T5 attention: no 1/sqrt(d) scaling.  Contract on last axes
            # (no explicit transpose / relayout of K).
            s = jax.lax.dot_general(
                q, k, (((1,), (1,)), ((), ())),
                preferred_element_type=jnp.float32)        # (S, S) f32
            s = s + bias_ref[h].astype(jnp.float32) + mask_bias

            m = jnp.max(s, axis=-1, keepdims=True)
            p = jnp.exp((s - m).astype(exp_dtype)).astype(jnp.float32)
            l = jnp.sum(p, axis=-1, keepdims=True)
            p = p * pl.reciprocal(l, approx=True)          # EUP, not VPU divide

            oh = jnp.dot(p.astype(v.dtype), v,
                         preferred_element_type=jnp.float32)   # (S, Dh)
            # Incremental store into the resident VMEM output block.
            o_ref[0, :, lo:lo + Dh] = oh.astype(o_ref.dtype)

    return kernel


def pallas_attention(qkv, pos_bias, mask_bias, d_model):
    """qkv: (BC, S, 3D) bf16; pos_bias: (H, S, S) bf16; mask_bias: (BC, 1, S) f32."""
    BC, S, threeD = qkv.shape
    D = d_model
    assert threeD == 3 * D
    H = pos_bias.shape[0]
    Dh = D // H
    exp_dtype = _exp_dtype_for_device()

    # TODO(synk): for S beyond ~512-1k (esp. on v7x's 64 MiB VMEM), move heads
    # into the grid / tile the KV axis flash-style so the bias and (S,S) score
    # tiles shrink; at FiD context lengths the whole-sequence form fits.
    kernel = _make_attention_kernel(H, Dh, D, exp_dtype)

    qb = qkv.dtype.itemsize
    needed = (2 * S * threeD * qb                       # qkv block, double-buf
              + 2 * H * S * S * pos_bias.dtype.itemsize # bias (constant index)
              + 2 * S * 4                               # mask block
              + 2 * S * D * qb                          # output block
              + 6 * S * S * 4)                          # score workspace headroom

    flops = 4 * BC * H * S * S * Dh
    bytes_accessed = (BC * S * threeD * qb
                      + H * S * S * pos_bias.dtype.itemsize
                      + BC * S * 4
                      + BC * S * D * qb)

    return pl.pallas_call(
        kernel,
        out_shape=jax.ShapeDtypeStruct((BC, S, D), qkv.dtype),
        grid=(BC,),
        in_specs=[
            pl.BlockSpec((1, S, threeD), lambda i: (i, 0, 0)),
            pl.BlockSpec((H, S, S), lambda i: (0, 0, 0)),   # constant index
            pl.BlockSpec((1, 1, S), lambda i: (i, 0, 0)),
        ],
        out_specs=pl.BlockSpec((1, S, D), lambda i: (i, 0, 0)),
        compiler_params=pltpu.CompilerParams(
            dimension_semantics=("parallel",),
            vmem_limit_bytes=_vmem_limit(needed)),
        cost_estimate=pl.CostEstimate(
            flops=flops, transcendentals=BC * H * S * S,
            bytes_accessed=bytes_accessed),
    )(qkv, pos_bias, mask_bias)


# ----------------------------------------------------------------------------
# T5 encoder glue (relative position bias, embedding, layer stacking)
# ----------------------------------------------------------------------------
def _relative_position_bucket(relative_position, num_buckets=32, max_distance=128):
    # Bidirectional bucketing (encoder side), as in HF T5.
    num_buckets = num_buckets // 2
    ret = (relative_position > 0).astype(jnp.int32) * num_buckets
    n = jnp.abs(relative_position)
    max_exact = num_buckets // 2
    is_small = n < max_exact
    safe_n = jnp.maximum(n, 1).astype(jnp.float32)
    val_if_large = max_exact + (
        jnp.log(safe_n / max_exact)
        / jnp.log(max_distance / max_exact)
        * (num_buckets - max_exact)
    ).astype(jnp.int32)
    val_if_large = jnp.minimum(val_if_large, num_buckets - 1)
    ret = ret + jnp.where(is_small, n, val_if_large)
    return ret


def _position_bias(rel_bias_table, seq_len, num_buckets):
    ctx = jnp.arange(seq_len)[:, None]
    mem = jnp.arange(seq_len)[None, :]
    rel_pos = mem - ctx
    buckets = _relative_position_bucket(rel_pos, num_buckets=num_buckets)
    bias = jnp.take(rel_bias_table, buckets, axis=0)            # (S, S, H)
    return jnp.transpose(bias, (2, 0, 1))                        # (H, S, S)


def t5_encoder(params, input_ids, attention_mask, cfg):
    """input_ids, attention_mask: (BC, S) -> hidden (BC, S, D) f32."""
    BC, S = input_ids.shape
    D = cfg.d_model
    M = BC * S

    # TODO(synk): embedding gather stays in plain JAX (data-dependent gather).
    x2d = jnp.take(params["embed"], input_ids, axis=0).reshape(M, D)   # bf16

    # Additive attention biases: mask kept in f32 (carries -1e9), position bias
    # cast to bf16 once (halves its VMEM/DMA footprint inside attention).
    mask_bias = ((1.0 - attention_mask.astype(jnp.float32)) * -1e9).reshape(BC, 1, S)
    pos_bias = _position_bias(params["rel_bias"], S, cfg.rel_buckets
                              ).astype(jnp.bfloat16)                   # (H, S, S)

    for layer in params["layers"]:
        # --- self-attention block: RMSNorm fused into the fused QKV matmul ---
        qkv = fused_matmul(x2d, layer["w_qkv"], ln=layer["ln1"])        # (M, 3D)
        # No JAX-side q/k/v slices: the attention kernel consumes the fused
        # (BC, S, 3D) tensor and slices heads at static lane offsets in-kernel.
        attn = pallas_attention(qkv.reshape(BC, S, 3 * D), pos_bias,
                                mask_bias, D)                           # (BC, S, D)
        # output projection with the residual add fused in the epilogue
        x2d = fused_matmul(attn.reshape(M, D), layer["wo"], residual=x2d)

        # --- feed-forward block (DenseReluDense), RMSNorm + ReLU fused ---
        h = fused_matmul(x2d, layer["wi"], ln=layer["ln2"], activation="relu")
        x2d = fused_matmul(h, layer["wo_ff"], residual=x2d)

    # final layer norm, output in f32 to match the reference module
    x = pallas_rmsnorm(x2d, params["ln_final"], out_dtype=jnp.float32)
    return x.reshape(BC, S, D)


# ----------------------------------------------------------------------------
# T5EncoderWrapper forward
# ----------------------------------------------------------------------------
@functools.partial(jax.jit, static_argnums=(3, 4))
def t5_encoder_wrapper_forward(params, input_ids, attention_mask, num_contexts, cfg):
    bsz, total_length = input_ids.shape
    context_length = total_length // num_contexts
    input_ids = input_ids.reshape(bsz * num_contexts, context_length)
    attention_mask = attention_mask.reshape(bsz * num_contexts, context_length)
    hidden = t5_encoder(params, input_ids, attention_mask, cfg)   # (B*NC, CL, D)
    hidden = hidden.reshape(bsz, num_contexts * context_length, -1)
    return (hidden,)


# ----------------------------------------------------------------------------
# Deterministic parameter init (bf16 weights, f32 norms / rel-bias table)
# ----------------------------------------------------------------------------
Config = namedtuple("Config", ["d_model", "n_heads", "d_ff", "vocab",
                               "rel_buckets", "n_layers"])


def init_params(key, cfg):
    D, Dff = cfg.d_model, cfg.d_ff
    V, NB, L, H = cfg.vocab, cfg.rel_buckets, cfg.n_layers, cfg.n_heads
    keys = jax.random.split(key, 2 + 4 * L)
    ki = iter(keys)

    def w(k, shape, scale=0.02):
        return (scale * jax.random.normal(k, shape, dtype=jnp.float32)
                ).astype(jnp.bfloat16)

    params = {
        "embed": w(next(ki), (V, D)),
        "rel_bias": 0.02 * jax.random.normal(next(ki), (NB, H), dtype=jnp.float32),
        "ln_final": jnp.ones((1, D), jnp.float32),
        "layers": [],
    }
    for _ in range(L):
        params["layers"].append(
            {
                "ln1": jnp.ones((1, D), jnp.float32),
                "w_qkv": w(next(ki), (D, 3 * D)),   # fused Wq | Wk | Wv
                "wo": w(next(ki), (D, D)),
                "ln2": jnp.ones((1, D), jnp.float32),
                "wi": w(next(ki), (D, Dff)),
                "wo_ff": w(next(ki), (Dff, D)),
            }
        )
    return params


# ----------------------------------------------------------------------------
if __name__ == "__main__":
    cfg = Config(d_model=128, n_heads=4, d_ff=256, vocab=100,
                 rel_buckets=32, n_layers=2)

    bsz = 2
    num_contexts = 2
    context_length = 8
    total_length = num_contexts * context_length  # 16

    key = jax.random.PRNGKey(0)
    k_param, k_ids = jax.random.split(key)
    params = init_params(k_param, cfg)

    input_ids = jax.random.randint(
        k_ids, (bsz, total_length), 0, cfg.vocab, dtype=jnp.int32
    )
    # mask out the last token of every context to exercise masking
    attention_mask = jnp.ones((bsz, num_contexts, context_length), jnp.int32)
    attention_mask = attention_mask.at[:, :, -1].set(0).reshape(bsz, total_length)

    outputs = t5_encoder_wrapper_forward(
        params, input_ids, attention_mask, num_contexts, cfg
    )
    hidden = jax.block_until_ready(outputs[0])

    expected_shape = (bsz, num_contexts * context_length, cfg.d_model)
    assert hidden.shape == expected_shape, (hidden.shape, expected_shape)
    assert bool(jnp.all(jnp.isfinite(hidden)))
    print("KERNEL_OK")
</pallas_src>

<mosaic_0001>
module attributes {stable_mosaic.version = 11 : i64} {
  func.func @kernel(%arg0: i32, %arg1: i32, %arg2: i32, %arg3: memref<32x128xbf16, #tpu.memory_space<vmem>>, %arg4: memref<128x384xbf16, #tpu.memory_space<vmem>>, %arg5: memref<1x128xf32, #tpu.memory_space<vmem>>, %arg6: memref<32x384xbf16, #tpu.memory_space<vmem>>, %arg7: memref<32x384xf32, #tpu.memory_space<vmem>>, %arg8: memref<32x128xbf16, #tpu.memory_space<vmem>>) attributes {dimension_semantics = [#tpu.dimension_semantics<parallel>, #tpu.dimension_semantics<arbitrary>, #tpu.dimension_semantics<arbitrary>], iteration_bounds = array<i64: 1, 1, 1>, scalar_prefetch = 0 : i64, scratch_operands = 2 : i64, tpu.core_type = #tpu.core_type<tc>, window_params = [{transform_indices = @transform_0, window_bounds = array<i64: 32, 128>}, {transform_indices = @transform_1, window_bounds = array<i64: 128, 384>}, {transform_indices = @transform_2, window_bounds = array<i64: 1, 128>}, {transform_indices = @transform_3, window_bounds = array<i64: 32, 384>}]} {
    %c0_i32 = arith.constant 0 : i32
    %0 = arith.cmpi eq, %arg2, %c0_i32 : i32
    %1 = arith.extui %0 : i1 to i32
    %c0_i32_0 = arith.constant 0 : i32
    %2 = arith.cmpi ne, %1, %c0_i32_0 : i32
    scf.if %2 {
      %cst_12 = arith.constant 0.000000e+00 : f32
      %15 = vector.broadcast %cst_12 : f32 to vector<32x384xf32>
      %c0_13 = arith.constant 0 : index
      %c0_14 = arith.constant 0 : index
      %16 = vector.load %arg7[%c0_13, %c0_14] : memref<32x384xf32, #tpu.memory_space<vmem>>, vector<32x384xf32>
      tpu.vector_store %arg7[%c0_13, %c0_14], %15 {strides = array<i32>} : memref<32x384xf32, #tpu.memory_space<vmem>>, vector<32x384xf32>,
    } else {
    }
    %c0_i32_1 = arith.constant 0 : i32
    %3 = arith.cmpi eq, %arg1, %c0_i32_1 : i32
    %4 = arith.extui %3 : i1 to i32
    %c0_i32_2 = arith.constant 0 : i32
    %5 = arith.cmpi ne, %4, %c0_i32_2 : i32
    scf.if %5 {
      %c0_12 = arith.constant 0 : index
      %c0_13 = arith.constant 0 : index
      %15 = vector.load %arg3[%c0_12, %c0_13] : memref<32x128xbf16, #tpu.memory_space<vmem>>, vector<32x128xbf16>
      %16 = arith.extf %15 : vector<32x128xbf16> to vector<32x128xf32>
      %17 = arith.mulf %16, %16 : vector<32x128xf32>
      %cst_14 = arith.constant dense<0.000000e+00> : vector<32xf32>
      %18 = vector.multi_reduction <add>, %17, %cst_14 [1] : vector<32x128xf32> to vector<32xf32>
      %19 = vector.shape_cast %18 : vector<32xf32> to vector<32x1xf32>
      %cst_15 = arith.constant 1.280000e+02 : f32
      %20 = vector.broadcast %cst_15 : f32 to vector<32x1xf32>
      %21 = arith.divf %19, %20 : vector<32x1xf32>
      %cst_16 = arith.constant 9.99999997E-7 : f32
      %22 = vector.broadcast %cst_16 : f32 to vector<32x1xf32>
      %23 = arith.addf %21, %22 : vector<32x1xf32>
      %24 = math.rsqrt %23 : vector<32x1xf32>
      %25 = vector.broadcast %24 : vector<32x1xf32> to vector<32x128xf32>
      %26 = arith.mulf %16, %25 : vector<32x128xf32>
      %c0_17 = arith.constant 0 : index
      %c0_18 = arith.constant 0 : index
      %27 = vector.load %arg5[%c0_17, %c0_18] : memref<1x128xf32, #tpu.memory_space<vmem>>, vector<1x128xf32>
      %28 = vector.broadcast %27 : vector<1x128xf32> to vector<32x128xf32>
      %29 = arith.mulf %26, %28 : vector<32x128xf32>
      %30 = arith.truncf %29 : vector<32x128xf32> to vector<32x128xbf16>
      %c0_19 = arith.constant 0 : index
      %c0_20 = arith.constant 0 : index
      %31 = vector.load %arg8[%c0_19, %c0_20] : memref<32x128xbf16, #tpu.memory_space<vmem>>, vector<32x128xbf16>
      tpu.vector_store %arg8[%c0_19, %c0_20], %30 {strides = array<i32>} : memref<32x128xbf16, #tpu.memory_space<vmem>>, vector<32x128xbf16>,
    } else {
    }
    %c0 = arith.constant 0 : index
    %c0_3 = arith.constant 0 : index
    %6 = vector.load %arg8[%c0, %c0_3] : memref<32x128xbf16, #tpu.memory_space<vmem>>, vector<32x128xbf16>
    %c0_4 = arith.constant 0 : index
    %c0_5 = arith.constant 0 : index
    %7 = vector.load %arg7[%c0_4, %c0_5] : memref<32x384xf32, #tpu.memory_space<vmem>>, vector<32x384xf32>
    %c0_6 = arith.constant 0 : index
    %c0_7 = arith.constant 0 : index
    %8 = vector.load %arg4[%c0_6, %c0_7] : memref<128x384xbf16, #tpu.memory_space<vmem>>, vector<128x384xbf16>
    %cst = arith.constant dense<0.000000e+00> : vector<32x384xf32>
    %9 = tpu.matmul %6, %8, %cst {dimension_numbers = #tpu.dot_dimension_numbers<[1], [0], [0], [1], [0, 0, 1, 1], [], []>} : vector<32x128xbf16>, vector<128x384xbf16>, vector<32x384xf32> -> vector<32x384xf32>
    %10 = arith.addf %7, %9 : vector<32x384xf32>
    %c0_8 = arith.constant 0 : index
    %c0_9 = arith.constant 0 : index
    %11 = vector.load %arg7[%c0_8, %c0_9] : memref<32x384xf32, #tpu.memory_space<vmem>>, vector<32x384xf32>
    tpu.vector_store %arg7[%c0_8, %c0_9], %10 {strides = array<i32>} : memref<32x384xf32, #tpu.memory_space<vmem>>, vector<32x384xf32>,
    %c0_i32_10 = arith.constant 0 : i32
    %12 = arith.cmpi eq, %arg2, %c0_i32_10 : i32
    %13 = arith.extui %12 : i1 to i32
    %c0_i32_11 = arith.constant 0 : i32
    %14 = arith.cmpi ne, %13, %c0_i32_11 : i32
    scf.if %14 {
      %c0_12 = arith.constant 0 : index
      %c0_13 = arith.constant 0 : index
      %15 = vector.load %arg7[%c0_12, %c0_13] : memref<32x384xf32, #tpu.memory_space<vmem>>, vector<32x384xf32>
      %16 = arith.truncf %15 : vector<32x384xf32> to vector<32x384xbf16>
      %c0_14 = arith.constant 0 : index
      %c0_15 = arith.constant 0 : index
      %17 = vector.load %arg6[%c0_14, %c0_15] : memref<32x384xbf16, #tpu.memory_space<vmem>>, vector<32x384xbf16>
      tpu.vector_store %arg6[%c0_14, %c0_15], %16 {strides = array<i32>} : memref<32x384xbf16, #tpu.memory_space<vmem>>, vector<32x384xbf16>,
    } else {
    }
    return
  }
  func.func @transform_0(%arg0: i32, %arg1: i32, %arg2: i32) -> (i32, i32) {
    %c0_i32 = arith.constant 0 : i32
    return %arg0, %arg2 : i32, i32
  }
  func.func @transform_1(%arg0: i32, %arg1: i32, %arg2: i32) -> (i32, i32) {
    %c0_i32 = arith.constant 0 : i32
    return %arg2, %arg1 : i32, i32
  }
  func.func @transform_2(%arg0: i32, %arg1: i32, %arg2: i32) -> (i32, i32) {
    %c0_i32 = arith.constant 0 : i32
    %c0_i32_0 = arith.constant 0 : i32
    return %c0_i32, %arg2 : i32, i32
  }
  func.func @transform_3(%arg0: i32, %arg1: i32, %arg2: i32) -> (i32, i32) {
    %c0_i32 = arith.constant 0 : i32
    return %arg0, %arg1 : i32, i32
  }
}

module attributes {stable_mosaic.version = 11 : i64} {
  func.func @kernel(%arg0: i32, %arg1: i32, %arg2: i32, %arg3: memref<32x128xbf16, #tpu.memory_space<vmem>>, %arg4: memref<128x128xbf16, #tpu.memory_space<vmem>>, %arg5: memref<32x128xbf16, #tpu.memory_space<vmem>>, %arg6: memref<32x128xbf16, #tpu.memory_space<vmem>>, %arg7: memref<32x128xf32, #tpu.memory_space<vmem>>) attributes {dimension_semantics = [#tpu.dimension_semantics<parallel>, #tpu.dimension_semantics<parallel>, #tpu.dimension_semantics<arbitrary>], iteration_bounds = array<i64: 1, 1, 1>, scalar_prefetch = 0 : i64, scratch_operands = 1 : i64, tpu.core_type = #tpu.core_type<tc>, window_params = [{transform_indices = @transform_0, window_bounds = array<i64: 32, 128>}, {transform_indices = @transform_1, window_bounds = array<i64: 128, 128>}, {transform_indices = @transform_2, window_bounds = array<i64: 32, 128>}, {transform_indices = @transform_3, window_bounds = array<i64: 32, 128>}]} {
    %c0_i32 = arith.constant 0 : i32
    %0 = arith.cmpi eq, %arg2, %c0_i32 : i32
    %1 = arith.extui %0 : i1 to i32
    %c0_i32_0 = arith.constant 0 : i32
    %2 = arith.cmpi ne, %1, %c0_i32_0 : i32
    scf.if %2 {
      %cst_10 = arith.constant 0.000000e+00 : f32
      %12 = vector.broadcast %cst_10 : f32 to vector<32x128xf32>
      %c0_11 = arith.constant 0 : index
      %c0_12 = arith.constant 0 : index
      %13 = vector.load %arg7[%c0_11, %c0_12] : memref<32x128xf32, #tpu.memory_space<vmem>>, vector<32x128xf32>
      tpu.vector_store %arg7[%c0_11, %c0_12], %12 {strides = array<i32>} : memref<32x128xf32, #tpu.memory_space<vmem>>, vector<32x128xf32>,
    } else {
    }
    %c0 = arith.constant 0 : index
    %c0_1 = arith.constant 0 : index
    %3 = vector.load %arg3[%c0, %c0_1] : memref<32x128xbf16, #tpu.memory_space<vmem>>, vector<32x128xbf16>
    %c0_2 = arith.constant 0 : index
    %c0_3 = arith.constant 0 : index
    %4 = vector.load %arg7[%c0_2, %c0_3] : memref<32x128xf32, #tpu.memory_space<vmem>>, vector<32x128xf32>
    %c0_4 = arith.constant 0 : index
    %c0_5 = arith.constant 0 : index
    %5 = vector.load %arg4[%c0_4, %c0_5] : memref<128x128xbf16, #tpu.memory_space<vmem>>, vector<128x128xbf16>
    %cst = arith.constant dense<0.000000e+00> : vector<32x128xf32>
    %6 = tpu.matmul %3, %5, %cst {dimension_numbers = #tpu.dot_dimension_numbers<[1], [0], [0], [1], [0, 0, 1, 1], [], []>} : vector<32x128xbf16>, vector<128x128xbf16>, vector<32x128xf32> -> vector<32x128xf32>
    %7 = arith.addf %4, %6 : vector<32x128xf32>
    %c0_6 = arith.constant 0 : index
    %c0_7 = arith.constant 0 : index
    %8 = vector.load %arg7[%c0_6, %c0_7] : memref<32x128xf32, #tpu.memory_space<vmem>>, vector<32x128xf32>
    tpu.vector_store %arg7[%c0_6, %c0_7], %7 {strides = array<i32>} : memref<32x128xf32, #tpu.memory_space<vmem>>, vector<32x128xf32>,
    %c0_i32_8 = arith.constant 0 : i32
    %9 = arith.cmpi eq, %arg2, %c0_i32_8 : i32
    %10 = arith.extui %9 : i1 to i32
    %c0_i32_9 = arith.constant 0 : i32
    %11 = arith.cmpi ne, %10, %c0_i32_9 : i32
    scf.if %11 {
      %c0_10 = arith.constant 0 : index
      %c0_11 = arith.constant 0 : index
      %12 = vector.load %arg7[%c0_10, %c0_11] : memref<32x128xf32, #tpu.memory_space<vmem>>, vector<32x128xf32>
      %c0_12 = arith.constant 0 : index
      %c0_13 = arith.constant 0 : index
      %13 = vector.load %arg5[%c0_12, %c0_13] : memref<32x128xbf16, #tpu.memory_space<vmem>>, vector<32x128xbf16>
      %14 = arith.extf %13 : vector<32x128xbf16> to vector<32x128xf32>
      %15 = arith.addf %12, %14 : vector<32x128xf32>
      %16 = arith.truncf %15 : vector<32x128xf32> to vector<32x128xbf16>
      %c0_14 = arith.constant 0 : index
      %c0_15 = arith.constant 0 : index
      %17 = vector.load %arg6[%c0_14, %c0_15] : memref<32x128xbf16, #tpu.memory_space<vmem>>, vector<32x128xbf16>
      tpu.vector_store %arg6[%c0_14, %c0_15], %16 {strides = array<i32>} : memref<32x128xbf16, #tpu.memory_space<vmem>>, vector<32x128xbf16>,
    } else {
    }
    return
  }
  func.func @transform_0(%arg0: i32, %arg1: i32, %arg2: i32) -> (i32, i32) {
    %c0_i32 = arith.constant 0 : i32
    return %arg0, %arg2 : i32, i32
  }
  func.func @transform_1(%arg0: i32, %arg1: i32, %arg2: i32) -> (i32, i32) {
    %c0_i32 = arith.constant 0 : i32
    return %arg2, %arg1 : i32, i32
  }
  func.func @transform_2(%arg0: i32, %arg1: i32, %arg2: i32) -> (i32, i32) {
    %c0_i32 = arith.constant 0 : i32
    return %arg0, %arg1 : i32, i32
  }
  func.func @transform_3(%arg0: i32, %arg1: i32, %arg2: i32) -> (i32, i32) {
    %c0_i32 = arith.constant 0 : i32
    return %arg0, %arg1 : i32, i32
  }
}

module attributes {stable_mosaic.version = 11 : i64} {
  func.func @kernel(%arg0: i32, %arg1: i32, %arg2: i32, %arg3: memref<32x128xbf16, #tpu.memory_space<vmem>>, %arg4: memref<128x256xbf16, #tpu.memory_space<vmem>>, %arg5: memref<1x128xf32, #tpu.memory_space<vmem>>, %arg6: memref<32x256xbf16, #tpu.memory_space<vmem>>, %arg7: memref<32x256xf32, #tpu.memory_space<vmem>>, %arg8: memref<32x128xbf16, #tpu.memory_space<vmem>>) attributes {dimension_semantics = [#tpu.dimension_semantics<parallel>, #tpu.dimension_semantics<arbitrary>, #tpu.dimension_semantics<arbitrary>], iteration_bounds = array<i64: 1, 1, 1>, scalar_prefetch = 0 : i64, scratch_operands = 2 : i64, tpu.core_type = #tpu.core_type<tc>, window_params = [{transform_indices = @transform_0, window_bounds = array<i64: 32, 128>}, {transform_indices = @transform_1, window_bounds = array<i64: 128, 256>}, {transform_indices = @transform_2, window_bounds = array<i64: 1, 128>}, {transform_indices = @transform_3, window_bounds = array<i64: 32, 256>}]} {
    %c0_i32 = arith.constant 0 : i32
    %0 = arith.cmpi eq, %arg2, %c0_i32 : i32
    %1 = arith.extui %0 : i1 to i32
    %c0_i32_0 = arith.constant 0 : i32
    %2 = arith.cmpi ne, %1, %c0_i32_0 : i32
    scf.if %2 {
      %cst_12 = arith.constant 0.000000e+00 : f32
      %15 = vector.broadcast %cst_12 : f32 to vector<32x256xf32>
      %c0_13 = arith.constant 0 : index
      %c0_14 = arith.constant 0 : index
      %16 = vector.load %arg7[%c0_13, %c0_14] : memref<32x256xf32, #tpu.memory_space<vmem>>, vector<32x256xf32>
      tpu.vector_store %arg7[%c0_13, %c0_14], %15 {strides = array<i32>} : memref<32x256xf32, #tpu.memory_space<vmem>>, vector<32x256xf32>,
    } else {
    }
    %c0_i32_1 = arith.constant 0 : i32
    %3 = arith.cmpi eq, %arg1, %c0_i32_1 : i32
    %4 = arith.extui %3 : i1 to i32
    %c0_i32_2 = arith.constant 0 : i32
    %5 = arith.cmpi ne, %4, %c0_i32_2 : i32
    scf.if %5 {
      %c0_12 = arith.constant 0 : index
      %c0_13 = arith.constant 0 : index
      %15 = vector.load %arg3[%c0_12, %c0_13] : memref<32x128xbf16, #tpu.memory_space<vmem>>, vector<32x128xbf16>
      %16 = arith.extf %15 : vector<32x128xbf16> to vector<32x128xf32>
      %17 = arith.mulf %16, %16 : vector<32x128xf32>
      %cst_14 = arith.constant dense<0.000000e+00> : vector<32xf32>
      %18 = vector.multi_reduction <add>, %17, %cst_14 [1] : vector<32x128xf32> to vector<32xf32>
      %19 = vector.shape_cast %18 : vector<32xf32> to vector<32x1xf32>
      %cst_15 = arith.constant 1.280000e+02 : f32
      %20 = vector.broadcast %cst_15 : f32 to vector<32x1xf32>
      %21 = arith.divf %19, %20 : vector<32x1xf32>
      %cst_16 = arith.constant 9.99999997E-7 : f32
      %22 = vector.broadcast %cst_16 : f32 to vector<32x1xf32>
      %23 = arith.addf %21, %22 : vector<32x1xf32>
      %24 = math.rsqrt %23 : vector<32x1xf32>
      %25 = vector.broadcast %24 : vector<32x1xf32> to vector<32x128xf32>
      %26 = arith.mulf %16, %25 : vector<32x128xf32>
      %c0_17 = arith.constant 0 : index
      %c0_18 = arith.constant 0 : index
      %27 = vector.load %arg5[%c0_17, %c0_18] : memref<1x128xf32, #tpu.memory_space<vmem>>, vector<1x128xf32>
      %28 = vector.broadcast %27 : vector<1x128xf32> to vector<32x128xf32>
      %29 = arith.mulf %26, %28 : vector<32x128xf32>
      %30 = arith.truncf %29 : vector<32x128xf32> to vector<32x128xbf16>
      %c0_19 = arith.constant 0 : index
      %c0_20 = arith.constant 0 : index
      %31 = vector.load %arg8[%c0_19, %c0_20] : memref<32x128xbf16, #tpu.memory_space<vmem>>, vector<32x128xbf16>
      tpu.vector_store %arg8[%c0_19, %c0_20], %30 {strides = array<i32>} : memref<32x128xbf16, #tpu.memory_space<vmem>>, vector<32x128xbf16>,
    } else {
    }
    %c0 = arith.constant 0 : index
    %c0_3 = arith.constant 0 : index
    %6 = vector.load %arg8[%c0, %c0_3] : memref<32x128xbf16, #tpu.memory_space<vmem>>, vector<32x128xbf16>
    %c0_4 = arith.constant 0 : index
    %c0_5 = arith.constant 0 : index
    %7 = vector.load %arg7[%c0_4, %c0_5] : memref<32x256xf32, #tpu.memory_space<vmem>>, vector<32x256xf32>
    %c0_6 = arith.constant 0 : index
    %c0_7 = arith.constant 0 : index
    %8 = vector.load %arg4[%c0_6, %c0_7] : memref<128x256xbf16, #tpu.memory_space<vmem>>, vector<128x256xbf16>
    %cst = arith.constant dense<0.000000e+00> : vector<32x256xf32>
    %9 = tpu.matmul %6, %8, %cst {dimension_numbers = #tpu.dot_dimension_numbers<[1], [0], [0], [1], [0, 0, 1, 1], [], []>} : vector<32x128xbf16>, vector<128x256xbf16>, vector<32x256xf32> -> vector<32x256xf32>
    %10 = arith.addf %7, %9 : vector<32x256xf32>
    %c0_8 = arith.constant 0 : index
    %c0_9 = arith.constant 0 : index
    %11 = vector.load %arg7[%c0_8, %c0_9] : memref<32x256xf32, #tpu.memory_space<vmem>>, vector<32x256xf32>
    tpu.vector_store %arg7[%c0_8, %c0_9], %10 {strides = array<i32>} : memref<32x256xf32, #tpu.memory_space<vmem>>, vector<32x256xf32>,
    %c0_i32_10 = arith.constant 0 : i32
    %12 = arith.cmpi eq, %arg2, %c0_i32_10 : i32
    %13 = arith.extui %12 : i1 to i32
    %c0_i32_11 = arith.constant 0 : i32
    %14 = arith.cmpi ne, %13, %c0_i32_11 : i32
    scf.if %14 {
      %c0_12 = arith.constant 0 : index
      %c0_13 = arith.constant 0 : index
      %15 = vector.load %arg7[%c0_12, %c0_13] : memref<32x256xf32, #tpu.memory_space<vmem>>, vector<32x256xf32>
      %cst_14 = arith.constant 0.000000e+00 : f32
      %16 = vector.broadcast %cst_14 : f32 to vector<32x256xf32>
      %17 = arith.maximumf %15, %16 : vector<32x256xf32>
      %18 = arith.truncf %17 : vector<32x256xf32> to vector<32x256xbf16>
      %c0_15 = arith.constant 0 : index
      %c0_16 = arith.constant 0 : index
      %19 = vector.load %arg6[%c0_15, %c0_16] : memref<32x256xbf16, #tpu.memory_space<vmem>>, vector<32x256xbf16>
      tpu.vector_store %arg6[%c0_15, %c0_16], %18 {strides = array<i32>} : memref<32x256xbf16, #tpu.memory_space<vmem>>, vector<32x256xbf16>,
    } else {
    }
    return
  }
  func.func @transform_0(%arg0: i32, %arg1: i32, %arg2: i32) -> (i32, i32) {
    %c0_i32 = arith.constant 0 : i32
    return %arg0, %arg2 : i32, i32
  }
  func.func @transform_1(%arg0: i32, %arg1: i32, %arg2: i32) -> (i32, i32) {
    %c0_i32 = arith.constant 0 : i32
    return %arg2, %arg1 : i32, i32
  }
  func.func @transform_2(%arg0: i32, %arg1: i32, %arg2: i32) -> (i32, i32) {
    %c0_i32 = arith.constant 0 : i32
    %c0_i32_0 = arith.constant 0 : i32
    return %c0_i32, %arg2 : i32, i32
  }
  func.func @transform_3(%arg0: i32, %arg1: i32, %arg2: i32) -> (i32, i32) {
    %c0_i32 = arith.constant 0 : i32
    return %arg0, %arg1 : i32, i32
  }
}

module attributes {stable_mosaic.version = 11 : i64} {
  func.func @kernel(%arg0: i32, %arg1: memref<1x8x384xbf16, #tpu.memory_space<vmem>>, %arg2: memref<4x8x8xbf16, #tpu.memory_space<vmem>>, %arg3: memref<1x1x8xf32, #tpu.memory_space<vmem>>, %arg4: memref<1x8x128xbf16, #tpu.memory_space<vmem>>) attributes {dimension_semantics = [#tpu.dimension_semantics<parallel>], iteration_bounds = array<i64: 4>, scalar_prefetch = 0 : i64, scratch_operands = 0 : i64, tpu.core_type = #tpu.core_type<tc>, window_params = [{transform_indices = @transform_0, window_bounds = array<i64: 1, 8, 384>}, {pipeline_mode = #tpu.pipeline_mode<synchronous>, transform_indices = @transform_1, window_bounds = array<i64: 4, 8, 8>}, {transform_indices = @transform_2, window_bounds = array<i64: 1, 1, 8>}, {transform_indices = @transform_3, window_bounds = array<i64: 1, 8, 128>}]} {
    %c0 = arith.constant 0 : index
    %c0_0 = arith.constant 0 : index
    %c0_1 = arith.constant 0 : index
    %0 = vector.load %arg3[%c0, %c0_0, %c0_1] : memref<1x1x8xf32, #tpu.memory_space<vmem>>, vector<1x1x8xf32>
    %1 = vector.shape_cast %0 : vector<1x1x8xf32> to vector<1x8xf32>
    %c0_2 = arith.constant 0 : index
    %c0_3 = arith.constant 0 : index
    %c0_4 = arith.constant 0 : index
    %2 = vector.load %arg1[%c0_2, %c0_3, %c0_4] : memref<1x8x384xbf16, #tpu.memory_space<vmem>>, vector<1x8x32xbf16>
    %3 = vector.shape_cast %2 : vector<1x8x32xbf16> to vector<8x32xbf16>
    %c0_5 = arith.constant 0 : index
    %c0_6 = arith.constant 0 : index
    %c128 = arith.constant 128 : index
    %4 = vector.load %arg1[%c0_5, %c0_6, %c128] : memref<1x8x384xbf16, #tpu.memory_space<vmem>>, vector<1x8x32xbf16>
    %5 = vector.shape_cast %4 : vector<1x8x32xbf16> to vector<8x32xbf16>
    %c0_7 = arith.constant 0 : index
    %c0_8 = arith.constant 0 : index
    %c256 = arith.constant 256 : index
    %6 = vector.load %arg1[%c0_7, %c0_8, %c256] : memref<1x8x384xbf16, #tpu.memory_space<vmem>>, vector<1x8x32xbf16>
    %7 = vector.shape_cast %6 : vector<1x8x32xbf16> to vector<8x32xbf16>
    %cst = arith.constant dense<0.000000e+00> : vector<8x8xf32>
    %8 = tpu.matmul %3, %5, %cst {dimension_numbers = #tpu.dot_dimension_numbers<[1], [1], [0], [0], [0, 0, 1, 0], [], []>} : vector<8x32xbf16>, vector<8x32xbf16>, vector<8x8xf32> -> vector<8x8xf32>
    %c0_9 = arith.constant 0 : index
    %c0_10 = arith.constant 0 : index
    %c0_11 = arith.constant 0 : index
    %9 = vector.load %arg2[%c0_9, %c0_10, %c0_11] : memref<4x8x8xbf16, #tpu.memory_space<vmem>>, vector<1x8x8xbf16>
    %10 = vector.shape_cast %9 : vector<1x8x8xbf16> to vector<8x8xbf16>
    %11 = arith.extf %10 : vector<8x8xbf16> to vector<8x8xf32>
    %12 = arith.addf %8, %11 : vector<8x8xf32>
    %13 = vector.broadcast %1 : vector<1x8xf32> to vector<8x8xf32>
    %14 = arith.addf %12, %13 : vector<8x8xf32>
    %cst_12 = arith.constant dense<0xFF800000> : vector<8xf32>
    %15 = vector.multi_reduction <maximumf>, %14, %cst_12 [1] : vector<8x8xf32> to vector<8xf32>
    %16 = vector.shape_cast %15 : vector<8xf32> to vector<8x1xf32>
    %17 = vector.broadcast %16 : vector<8x1xf32> to vector<8x8xf32>
    %18 = arith.subf %14, %17 : vector<8x8xf32>
    %19 = math.exp %18 : vector<8x8xf32>
    %cst_13 = arith.constant dense<0.000000e+00> : vector<8xf32>
    %20 = vector.multi_reduction <add>, %19, %cst_13 [1] : vector<8x8xf32> to vector<8xf32>
    %21 = vector.shape_cast %20 : vector<8xf32> to vector<8x1xf32>
    %22 = tpu.reciprocal %21 {approx = true} : vector<8x1xf32> -> vector<8x1xf32>
    %23 = vector.broadcast %22 : vector<8x1xf32> to vector<8x8xf32>
    %24 = arith.mulf %19, %23 : vector<8x8xf32>
    %25 = arith.truncf %24 : vector<8x8xf32> to vector<8x8xbf16>
    %cst_14 = arith.constant dense<0.000000e+00> : vector<8x32xf32>
    %26 = tpu.matmul %25, %7, %cst_14 {dimension_numbers = #tpu.dot_dimension_numbers<[1], [0], [0], [1], [0, 0, 1, 1], [], []>} : vector<8x8xbf16>, vector<8x32xbf16>, vector<8x32xf32> -> vector<8x32xf32>
    %27 = arith.truncf %26 : vector<8x32xf32> to vector<8x32xbf16>
    %c0_15 = arith.constant 0 : index
    %c0_16 = arith.constant 0 : index
    %c0_17 = arith.constant 0 : index
    %28 = vector.load %arg4[%c0_15, %c0_16, %c0_17] : memref<1x8x128xbf16, #tpu.memory_space<vmem>>, vector<1x8x32xbf16>
    %29 = vector.shape_cast %28 : vector<1x8x32xbf16> to vector<8x32xbf16>
    %30 = vector.shape_cast %27 : vector<8x32xbf16> to vector<1x8x32xbf16>
    tpu.vector_store %arg4[%c0_15, %c0_16, %c0_17], %30 {strides = array<i32>} : memref<1x8x128xbf16, #tpu.memory_space<vmem>>, vector<1x8x32xbf16>,
    %c0_18 = arith.constant 0 : index
    %c0_19 = arith.constant 0 : index
    %c32 = arith.constant 32 : index
    %31 = vector.load %arg1[%c0_18, %c0_19, %c32] : memref<1x8x384xbf16, #tpu.memory_space<vmem>>, vector<1x8x32xbf16>
    %32 = vector.shape_cast %31 : vector<1x8x32xbf16> to vector<8x32xbf16>
    %c0_20 = arith.constant 0 : index
    %c0_21 = arith.constant 0 : index
    %c160 = arith.constant 160 : index
    %33 = vector.load %arg1[%c0_20, %c0_21, %c160] : memref<1x8x384xbf16, #tpu.memory_space<vmem>>, vector<1x8x32xbf16>
    %34 = vector.shape_cast %33 : vector<1x8x32xbf16> to vector<8x32xbf16>
    %c0_22 = arith.constant 0 : index
    %c0_23 = arith.constant 0 : index
    %c288 = arith.constant 288 : index
    %35 = vector.load %arg1[%c0_22, %c0_23, %c288] : memref<1x8x384xbf16, #tpu.memory_space<vmem>>, vector<1x8x32xbf16>
    %36 = vector.shape_cast %35 : vector<1x8x32xbf16> to vector<8x32xbf16>
    %cst_24 = arith.constant dense<0.000000e+00> : vector<8x8xf32>
    %37 = tpu.matmul %32, %34, %cst_24 {dimension_numbers = #tpu.dot_dimension_numbers<[1], [1], [0], [0], [0, 0, 1, 0], [], []>} : vector<8x32xbf16>, vector<8x32xbf16>, vector<8x8xf32> -> vector<8x8xf32>
    %c1 = arith.constant 1 : index
    %c0_25 = arith.constant 0 : index
    %c0_26 = arith.constant 0 : index
    %38 = vector.load %arg2[%c1, %c0_25, %c0_26] : memref<4x8x8xbf16, #tpu.memory_space<vmem>>, vector<1x8x8xbf16>
    %39 = vector.shape_cast %38 : vector<1x8x8xbf16> to vector<8x8xbf16>
    %40 = arith.extf %39 : vector<8x8xbf16> to vector<8x8xf32>
    %41 = arith.addf %37, %40 : vector<8x8xf32>
    %42 = vector.broadcast %1 : vector<1x8xf32> to vector<8x8xf32>
    %43 = arith.addf %41, %42 : vector<8x8xf32>
    %cst_27 = arith.constant dense<0xFF800000> : vector<8xf32>
    %44 = vector.multi_reduction <maximumf>, %43, %cst_27 [1] : vector<8x8xf32> to vector<8xf32>
    %45 = vector.shape_cast %44 : vector<8xf32> to vector<8x1xf32>
    %46 = vector.broadcast %45 : vector<8x1xf32> to vector<8x8xf32>
    %47 = arith.subf %43, %46 : vector<8x8xf32>
    %48 = math.exp %47 : vector<8x8xf32>
    %cst_28 = arith.constant dense<0.000000e+00> : vector<8xf32>
    %49 = vector.multi_reduction <add>, %48, %cst_28 [1] : vector<8x8xf32> to vector<8xf32>
    %50 = vector.shape_cast %49 : vector<8xf32> to vector<8x1xf32>
    %51 = tpu.reciprocal %50 {approx = true} : vector<8x1xf32> -> vector<8x1xf32>
    %52 = vector.broadcast %51 : vector<8x1xf32> to vector<8x8xf32>
    %53 = arith.mulf %48, %52 : vector<8x8xf32>
    %54 = arith.truncf %53 : vector<8x8xf32> to vector<8x8xbf16>
    %cst_29 = arith.constant dense<0.000000e+00> : vector<8x32xf32>
    %55 = tpu.matmul %54, %36, %cst_29 {dimension_numbers = #tpu.dot_dimension_numbers<[1], [0], [0], [1], [0, 0, 1, 1], [], []>} : vector<8x8xbf16>, vector<8x32xbf16>, vector<8x32xf32> -> vector<8x32xf32>
    %56 = arith.truncf %55 : vector<8x32xf32> to vector<8x32xbf16>
    %c0_30 = arith.constant 0 : index
    %c0_31 = arith.constant 0 : index
    %c32_32 = arith.constant 32 : index
    %57 = vector.load %arg4[%c0_30, %c0_31, %c32_32] : memref<1x8x128xbf16, #tpu.memory_space<vmem>>, vector<1x8x32xbf16>
    %58 = vector.shape_cast %57 : vector<1x8x32xbf16> to vector<8x32xbf16>
    %59 = vector.shape_cast %56 : vector<8x32xbf16> to vector<1x8x32xbf16>
    tpu.vector_store %arg4[%c0_30, %c0_31, %c32_32], %59 {strides = array<i32>} : memref<1x8x128xbf16, #tpu.memory_space<vmem>>, vector<1x8x32xbf16>,
    %c0_33 = arith.constant 0 : index
    %c0_34 = arith.constant 0 : index
    %c64 = arith.constant 64 : index
    %60 = vector.load %arg1[%c0_33, %c0_34, %c64] : memref<1x8x384xbf16, #tpu.memory_space<vmem>>, vector<1x8x32xbf16>
    %61 = vector.shape_cast %60 : vector<1x8x32xbf16> to vector<8x32xbf16>
    %c0_35 = arith.constant 0 : index
    %c0_36 = arith.constant 0 : index
    %c192 = arith.constant 192 : index
    %62 = vector.load %arg1[%c0_35, %c0_36, %c192] : memref<1x8x384xbf16, #tpu.memory_space<vmem>>, vector<1x8x32xbf16>
    %63 = vector.shape_cast %62 : vector<1x8x32xbf16> to vector<8x32xbf16>
    %c0_37 = arith.constant 0 : index
    %c0_38 = arith.constant 0 : index
    %c320 = arith.constant 320 : index
    %64 = vector.load %arg1[%c0_37, %c0_38, %c320] : memref<1x8x384xbf16, #tpu.memory_space<vmem>>, vector<1x8x32xbf16>
    %65 = vector.shape_cast %64 : vector<1x8x32xbf16> to vector<8x32xbf16>
    %cst_39 = arith.constant dense<0.000000e+00> : vector<8x8xf32>
    %66 = tpu.matmul %61, %63, %cst_39 {dimension_numbers = #tpu.dot_dimension_numbers<[1], [1], [0], [0], [0, 0, 1, 0], [], []>} : vector<8x32xbf16>, vector<8x32xbf16>, vector<8x8xf32> -> vector<8x8xf32>
    %c2 = arith.constant 2 : index
    %c0_40 = arith.constant 0 : index
    %c0_41 = arith.constant 0 : index
    %67 = vector.load %arg2[%c2, %c0_40, %c0_41] : memref<4x8x8xbf16, #tpu.memory_space<vmem>>, vector<1x8x8xbf16>
    %68 = vector.shape_cast %67 : vector<1x8x8xbf16> to vector<8x8xbf16>
    %69 = arith.extf %68 : vector<8x8xbf16> to vector<8x8xf32>
    %70 = arith.addf %66, %69 : vector<8x8xf32>
    %71 = vector.broadcast %1 : vector<1x8xf32> to vector<8x8xf32>
    %72 = arith.addf %70, %71 : vector<8x8xf32>
    %cst_42 = arith.constant dense<0xFF800000> : vector<8xf32>
    %73 = vector.multi_reduction <maximumf>, %72, %cst_42 [1] : vector<8x8xf32> to vector<8xf32>
    %74 = vector.shape_cast %73 : vector<8xf32> to vector<8x1xf32>
    %75 = vector.broadcast %74 : vector<8x1xf32> to vector<8x8xf32>
    %76 = arith.subf %72, %75 : vector<8x8xf32>
    %77 = math.exp %76 : vector<8x8xf32>
    %cst_43 = arith.constant dense<0.000000e+00> : vector<8xf32>
    %78 = vector.multi_reduction <add>, %77, %cst_43 [1] : vector<8x8xf32> to vector<8xf32>
    %79 = vector.shape_cast %78 : vector<8xf32> to vector<8x1xf32>
    %80 = tpu.reciprocal %79 {approx = true} : vector<8x1xf32> -> vector<8x1xf32>
    %81 = vector.broadcast %80 : vector<8x1xf32> to vector<8x8xf32>
    %82 = arith.mulf %77, %81 : vector<8x8xf32>
    %83 = arith.truncf %82 : vector<8x8xf32> to vector<8x8xbf16>
    %cst_44 = arith.constant dense<0.000000e+00> : vector<8x32xf32>
    %84 = tpu.matmul %83, %65, %cst_44 {dimension_numbers = #tpu.dot_dimension_numbers<[1], [0], [0], [1], [0, 0, 1, 1], [], []>} : vector<8x8xbf16>, vector<8x32xbf16>, vector<8x32xf32> -> vector<8x32xf32>
    %85 = arith.truncf %84 : vector<8x32xf32> to vector<8x32xbf16>
    %c0_45 = arith.constant 0 : index
    %c0_46 = arith.constant 0 : index
    %c64_47 = arith.constant 64 : index
    %86 = vector.load %arg4[%c0_45, %c0_46, %c64_47] : memref<1x8x128xbf16, #tpu.memory_space<vmem>>, vector<1x8x32xbf16>
    %87 = vector.shape_cast %86 : vector<1x8x32xbf16> to vector<8x32xbf16>
    %88 = vector.shape_cast %85 : vector<8x32xbf16> to vector<1x8x32xbf16>
    tpu.vector_store %arg4[%c0_45, %c0_46, %c64_47], %88 {strides = array<i32>} : memref<1x8x128xbf16, #tpu.memory_space<vmem>>, vector<1x8x32xbf16>,
    %c0_48 = arith.constant 0 : index
    %c0_49 = arith.constant 0 : index
    %c96 = arith.constant 96 : index
    %89 = vector.load %arg1[%c0_48, %c0_49, %c96] : memref<1x8x384xbf16, #tpu.memory_space<vmem>>, vector<1x8x32xbf16>
    %90 = vector.shape_cast %89 : vector<1x8x32xbf16> to vector<8x32xbf16>
    %c0_50 = arith.constant 0 : index
    %c0_51 = arith.constant 0 : index
    %c224 = arith.constant 224 : index
    %91 = vector.load %arg1[%c0_50, %c0_51, %c224] : memref<1x8x384xbf16, #tpu.memory_space<vmem>>, vector<1x8x32xbf16>
    %92 = vector.shape_cast %91 : vector<1x8x32xbf16> to vector<8x32xbf16>
    %c0_52 = arith.constant 0 : index
    %c0_53 = arith.constant 0 : index
    %c352 = arith.constant 352 : index
    %93 = vector.load %arg1[%c0_52, %c0_53, %c352] : memref<1x8x384xbf16, #tpu.memory_space<vmem>>, vector<1x8x32xbf16>
    %94 = vector.shape_cast %93 : vector<1x8x32xbf16> to vector<8x32xbf16>
    %cst_54 = arith.constant dense<0.000000e+00> : vector<8x8xf32>
    %95 = tpu.matmul %90, %92, %cst_54 {dimension_numbers = #tpu.dot_dimension_numbers<[1], [1], [0], [0], [0, 0, 1, 0], [], []>} : vector<8x32xbf16>, vector<8x32xbf16>, vector<8x8xf32> -> vector<8x8xf32>
    %c3 = arith.constant 3 : index
    %c0_55 = arith.constant 0 : index
    %c0_56 = arith.constant 0 : index
    %96 = vector.load %arg2[%c3, %c0_55, %c0_56] : memref<4x8x8xbf16, #tpu.memory_space<vmem>>, vector<1x8x8xbf16>
    %97 = vector.shape_cast %96 : vector<1x8x8xbf16> to vector<8x8xbf16>
    %98 = arith.extf %97 : vector<8x8xbf16> to vector<8x8xf32>
    %99 = arith.addf %95, %98 : vector<8x8xf32>
    %100 = vector.broadcast %1 : vector<1x8xf32> to vector<8x8xf32>
    %101 = arith.addf %99, %100 : vector<8x8xf32>
    %cst_57 = arith.constant dense<0xFF800000> : vector<8xf32>
    %102 = vector.multi_reduction <maximumf>, %101, %cst_57 [1] : vector<8x8xf32> to vector<8xf32>
    %103 = vector.shape_cast %102 : vector<8xf32> to vector<8x1xf32>
    %104 = vector.broadcast %103 : vector<8x1xf32> to vector<8x8xf32>
    %105 = arith.subf %101, %104 : vector<8x8xf32>
    %106 = math.exp %105 : vector<8x8xf32>
    %cst_58 = arith.constant dense<0.000000e+00> : vector<8xf32>
    %107 = vector.multi_reduction <add>, %106, %cst_58 [1] : vector<8x8xf32> to vector<8xf32>
    %108 = vector.shape_cast %107 : vector<8xf32> to vector<8x1xf32>
    %109 = tpu.reciprocal %108 {approx = true} : vector<8x1xf32> -> vector<8x1xf32>
    %110 = vector.broadcast %109 : vector<8x1xf32> to vector<8x8xf32>
    %111 = arith.mulf %106, %110 : vector<8x8xf32>
    %112 = arith.truncf %111 : vector<8x8xf32> to vector<8x8xbf16>
    %cst_59 = arith.constant dense<0.000000e+00> : vector<8x32xf32>
    %113 = tpu.matmul %112, %94, %cst_59 {dimension_numbers = #tpu.dot_dimension_numbers<[1], [0], [0], [1], [0, 0, 1, 1], [], []>} : vector<8x8xbf16>, vector<8x32xbf16>, vector<8x32xf32> -> vector<8x32xf32>
    %114 = arith.truncf %113 : vector<8x32xf32> to vector<8x32xbf16>
    %c0_60 = arith.constant 0 : index
    %c0_61 = arith.constant 0 : index
    %c96_62 = arith.constant 96 : index
    %115 = vector.load %arg4[%c0_60, %c0_61, %c96_62] : memref<1x8x128xbf16, #tpu.memory_space<vmem>>, vector<1x8x32xbf16>
    %116 = vector.shape_cast %115 : vector<1x8x32xbf16> to vector<8x32xbf16>
    %117 = vector.shape_cast %114 : vector<8x32xbf16> to vector<1x8x32xbf16>
    tpu.vector_store %arg4[%c0_60, %c0_61, %c96_62], %117 {strides = array<i32>} : memref<1x8x128xbf16, #tpu.memory_space<vmem>>, vector<1x8x32xbf16>,
    return
  }
  func.func @transform_0(%arg0: i32) -> (i32, i32, i32) {
    %c0_i32 = arith.constant 0 : i32
    %c0_i32_0 = arith.constant 0 : i32
    %c0_i32_1 = arith.constant 0 : i32
    return %arg0, %c0_i32, %c0_i32_0 : i32, i32, i32
  }
  func.func @transform_1(%arg0: i32) -> (i32, i32, i32) {
    %c0_i32 = arith.constant 0 : i32
    %c0_i32_0 = arith.constant 0 : i32
    %c0_i32_1 = arith.constant 0 : i32
    %c0_i32_2 = arith.constant 0 : i32
    return %c0_i32, %c0_i32_0, %c0_i32_1 : i32, i32, i32
  }
  func.func @transform_2(%arg0: i32) -> (i32, i32, i32) {
    %c0_i32 = arith.constant 0 : i32
    %c0_i32_0 = arith.constant 0 : i32
    %c0_i32_1 = arith.constant 0 : i32
    return %arg0, %c0_i32, %c0_i32_0 : i32, i32, i32
  }
  func.func @transform_3(%arg0: i32) -> (i32, i32, i32) {
    %c0_i32 = arith.constant 0 : i32
    %c0_i32_0 = arith.constant 0 : i32
    %c0_i32_1 = arith.constant 0 : i32
    return %arg0, %c0_i32, %c0_i32_0 : i32, i32, i32
  }
}

module attributes {stable_mosaic.version = 11 : i64} {
  func.func @kernel(%arg0: i32, %arg1: i32, %arg2: i32, %arg3: memref<32x256xbf16, #tpu.memory_space<vmem>>, %arg4: memref<256x128xbf16, #tpu.memory_space<vmem>>, %arg5: memref<32x128xbf16, #tpu.memory_space<vmem>>, %arg6: memref<32x128xbf16, #tpu.memory_space<vmem>>, %arg7: memref<32x128xf32, #tpu.memory_space<vmem>>) attributes {dimension_semantics = [#tpu.dimension_semantics<parallel>, #tpu.dimension_semantics<parallel>, #tpu.dimension_semantics<arbitrary>], iteration_bounds = array<i64: 1, 1, 1>, scalar_prefetch = 0 : i64, scratch_operands = 1 : i64, tpu.core_type = #tpu.core_type<tc>, window_params = [{transform_indices = @transform_0, window_bounds = array<i64: 32, 256>}, {transform_indices = @transform_1, window_bounds = array<i64: 256, 128>}, {transform_indices = @transform_2, window_bounds = array<i64: 32, 128>}, {transform_indices = @transform_3, window_bounds = array<i64: 32, 128>}]} {
    %c0_i32 = arith.constant 0 : i32
    %0 = arith.cmpi eq, %arg2, %c0_i32 : i32
    %1 = arith.extui %0 : i1 to i32
    %c0_i32_0 = arith.constant 0 : i32
    %2 = arith.cmpi ne, %1, %c0_i32_0 : i32
    scf.if %2 {
      %cst_10 = arith.constant 0.000000e+00 : f32
      %12 = vector.broadcast %cst_10 : f32 to vector<32x128xf32>
      %c0_11 = arith.constant 0 : index
      %c0_12 = arith.constant 0 : index
      %13 = vector.load %arg7[%c0_11, %c0_12] : memref<32x128xf32, #tpu.memory_space<vmem>>, vector<32x128xf32>
      tpu.vector_store %arg7[%c0_11, %c0_12], %12 {strides = array<i32>} : memref<32x128xf32, #tpu.memory_space<vmem>>, vector<32x128xf32>,
    } else {
    }
    %c0 = arith.constant 0 : index
    %c0_1 = arith.constant 0 : index
    %3 = vector.load %arg3[%c0, %c0_1] : memref<32x256xbf16, #tpu.memory_space<vmem>>, vector<32x256xbf16>
    %c0_2 = arith.constant 0 : index
    %c0_3 = arith.constant 0 : index
    %4 = vector.load %arg7[%c0_2, %c0_3] : memref<32x128xf32, #tpu.memory_space<vmem>>, vector<32x128xf32>
    %c0_4 = arith.constant 0 : index
    %c0_5 = arith.constant 0 : index
    %5 = vector.load %arg4[%c0_4, %c0_5] : memref<256x128xbf16, #tpu.memory_space<vmem>>, vector<256x128xbf16>
    %cst = arith.constant dense<0.000000e+00> : vector<32x128xf32>
    %6 = tpu.matmul %3, %5, %cst {dimension_numbers = #tpu.dot_dimension_numbers<[1], [0], [0], [1], [0, 0, 1, 1], [], []>} : vector<32x256xbf16>, vector<256x128xbf16>, vector<32x128xf32> -> vector<32x128xf32>
    %7 = arith.addf %4, %6 : vector<32x128xf32>
    %c0_6 = arith.constant 0 : index
    %c0_7 = arith.constant 0 : index
    %8 = vector.load %arg7[%c0_6, %c0_7] : memref<32x128xf32, #tpu.memory_space<vmem>>, vector<32x128xf32>
    tpu.vector_store %arg7[%c0_6, %c0_7], %7 {strides = array<i32>} : memref<32x128xf32, #tpu.memory_space<vmem>>, vector<32x128xf32>,
    %c0_i32_8 = arith.constant 0 : i32
    %9 = arith.cmpi eq, %arg2, %c0_i32_8 : i32
    %10 = arith.extui %9 : i1 to i32
    %c0_i32_9 = arith.constant 0 : i32
    %11 = arith.cmpi ne, %10, %c0_i32_9 : i32
    scf.if %11 {
      %c0_10 = arith.constant 0 : index
      %c0_11 = arith.constant 0 : index
      %12 = vector.load %arg7[%c0_10, %c0_11] : memref<32x128xf32, #tpu.memory_space<vmem>>, vector<32x128xf32>
      %c0_12 = arith.constant 0 : index
      %c0_13 = arith.constant 0 : index
      %13 = vector.load %arg5[%c0_12, %c0_13] : memref<32x128xbf16, #tpu.memory_space<vmem>>, vector<32x128xbf16>
      %14 = arith.extf %13 : vector<32x128xbf16> to vector<32x128xf32>
      %15 = arith.addf %12, %14 : vector<32x128xf32>
      %16 = arith.truncf %15 : vector<32x128xf32> to vector<32x128xbf16>
      %c0_14 = arith.constant 0 : index
      %c0_15 = arith.constant 0 : index
      %17 = vector.load %arg6[%c0_14, %c0_15] : memref<32x128xbf16, #tpu.memory_space<vmem>>, vector<32x128xbf16>
      tpu.vector_store %arg6[%c0_14, %c0_15], %16 {strides = array<i32>} : memref<32x128xbf16, #tpu.memory_space<vmem>>, vector<32x128xbf16>,
    } else {
    }
    return
  }
  func.func @transform_0(%arg0: i32, %arg1: i32, %arg2: i32) -> (i32, i32) {
    %c0_i32 = arith.constant 0 : i32
    return %arg0, %arg2 : i32, i32
  }
  func.func @transform_1(%arg0: i32, %arg1: i32, %arg2: i32) -> (i32, i32) {
    %c0_i32 = arith.constant 0 : i32
    return %arg2, %arg1 : i32, i32
  }
  func.func @transform_2(%arg0: i32, %arg1: i32, %arg2: i32) -> (i32, i32) {
    %c0_i32 = arith.constant 0 : i32
    return %arg0, %arg1 : i32, i32
  }
  func.func @transform_3(%arg0: i32, %arg1: i32, %arg2: i32) -> (i32, i32) {
    %c0_i32 = arith.constant 0 : i32
    return %arg0, %arg1 : i32, i32
  }
}

module attributes {stable_mosaic.version = 11 : i64} {
  func.func @_rmsnorm_kernel(%arg0: i32, %arg1: memref<32x128xbf16, #tpu.memory_space<vmem>>, %arg2: memref<1x128xf32, #tpu.memory_space<vmem>>, %arg3: memref<32x128xf32, #tpu.memory_space<vmem>>) attributes {dimension_semantics = [#tpu.dimension_semantics<parallel>], iteration_bounds = array<i64: 1>, scalar_prefetch = 0 : i64, scratch_operands = 0 : i64, tpu.core_type = #tpu.core_type<tc>, window_params = [{transform_indices = @transform_0, window_bounds = array<i64: 32, 128>}, {pipeline_mode = #tpu.pipeline_mode<synchronous>, transform_indices = @transform_1, window_bounds = array<i64: 1, 128>}, {transform_indices = @transform_2, window_bounds = array<i64: 32, 128>}]} {
    %c0 = arith.constant 0 : index
    %c0_0 = arith.constant 0 : index
    %0 = vector.load %arg1[%c0, %c0_0] : memref<32x128xbf16, #tpu.memory_space<vmem>>, vector<32x128xbf16>
    %1 = arith.extf %0 : vector<32x128xbf16> to vector<32x128xf32>
    %2 = arith.mulf %1, %1 : vector<32x128xf32>
    %cst = arith.constant dense<0.000000e+00> : vector<32xf32>
    %3 = vector.multi_reduction <add>, %2, %cst [1] : vector<32x128xf32> to vector<32xf32>
    %4 = vector.shape_cast %3 : vector<32xf32> to vector<32x1xf32>
    %cst_1 = arith.constant 1.280000e+02 : f32
    %5 = vector.broadcast %cst_1 : f32 to vector<32x1xf32>
    %6 = arith.divf %4, %5 : vector<32x1xf32>
    %cst_2 = arith.constant 9.99999997E-7 : f32
    %7 = vector.broadcast %cst_2 : f32 to vector<32x1xf32>
    %8 = arith.addf %6, %7 : vector<32x1xf32>
    %9 = math.rsqrt %8 : vector<32x1xf32>
    %10 = vector.broadcast %9 : vector<32x1xf32> to vector<32x128xf32>
    %11 = arith.mulf %1, %10 : vector<32x128xf32>
    %c0_3 = arith.constant 0 : index
    %c0_4 = arith.constant 0 : index
    %12 = vector.load %arg2[%c0_3, %c0_4] : memref<1x128xf32, #tpu.memory_space<vmem>>, vector<1x128xf32>
    %13 = vector.broadcast %12 : vector<1x128xf32> to vector<32x128xf32>
    %14 = arith.mulf %11, %13 : vector<32x128xf32>
    %c0_5 = arith.constant 0 : index
    %c0_6 = arith.constant 0 : index
    %15 = vector.load %arg3[%c0_5, %c0_6] : memref<32x128xf32, #tpu.memory_space<vmem>>, vector<32x128xf32>
    tpu.vector_store %arg3[%c0_5, %c0_6], %14 {strides = array<i32>} : memref<32x128xf32, #tpu.memory_space<vmem>>, vector<32x128xf32>,
    return
  }
  func.func @transform_0(%arg0: i32) -> (i32, i32) {
    %c0_i32 = arith.constant 0 : i32
    %c0_i32_0 = arith.constant 0 : i32
    return %arg0, %c0_i32 : i32, i32
  }
  func.func @transform_1(%arg0: i32) -> (i32, i32) {
    %c0_i32 = arith.constant 0 : i32
    %c0_i32_0 = arith.constant 0 : i32
    %c0_i32_1 = arith.constant 0 : i32
    return %c0_i32, %c0_i32_0 : i32, i32
  }
  func.func @transform_2(%arg0: i32) -> (i32, i32) {
    %c0_i32 = arith.constant 0 : i32
    %c0_i32_0 = arith.constant 0 : i32
    return %arg0, %c0_i32 : i32, i32
  }
}

</mosaic_0001>

<bundles_post_ra>
// kernel: t5_encoder_wrapper_forward.14
= control target key start
LH: loop header
LB: loop body
LE: loop exit
PB: predicated region body
PF: predicated region fallthrough
CT: control target
= control target key end

     0   :  { %v392_v23 = vmov 0   ;;  %s502_s0 = inlined_call_operand.vmem [shape: bf16[32,128], index: 0, kind: input, shape index: {}]   ;;  %s503_s1 = inlined_call_operand.vmem [shape: bf16[128,256], index: 1, kind: input, shape index: {}]   ;;  %s504_s2 = inlined_call_operand.vmem [shape: f32[1,128], index: 2, kind: input, shape index: {}]   ;;  %s505_s3 = inlined_call_operand.vmem [shape: bf16[32,256], index: 3, kind: output, shape index: {}]  }
   0x1   :  { %v342_v0 = vld [vmem:[%s502_s0 + $0x8] sm:$0xff]   ;;  %v335_v1 = vld [vmem:[%s502_s0] sm:$0xff]   ;;  %v363_v8 = vld [vmem:[%s503_s1 + $0x14] ss:$8 sps:$4 sm:$0xff]   ;;  %221 = vmatprep.mubr.bf16.mxu0 %v392_v23  ;;  %231 = vmatprep.mubr.bf16.mxu1 %v392_v23 }
   0x2   :  { %v419_v2 = vunpack.c.l.bf16 %v342_v0  ;;  %v421_v3 = vunpack.c.l.bf16 %v335_v1  ;;  %v423_v4 = vunpack.c.h.bf16 %v342_v0  ;;  %v425_v5 = vunpack.c.h.bf16 %v335_v1  ;;  %v360_v6 = vld [vmem:[%s503_s1 + $0x4] ss:$8 sps:$4 sm:$0xff]   ;;  %v362_v7 = vld [vmem:[%s503_s1] ss:$8 sps:$4 sm:$0xff]   ;;  %v365_v11 = vld [vmem:[%s503_s1 + $0x10] ss:$8 sps:$4 sm:$0xff]  }
   0x3   :  { %189 = vmatprep.subr.bf16.mxu0 %v360_v6  ;;  %343 = vmatprep.subr.bf16.mxu1 %v360_v6  ;;  %v366_v14 = vld [vmem:[%s503_s1 + $0x24] ss:$8 sps:$4 sm:$0xff]   ;;  %v368_v15 = vld [vmem:[%s503_s1 + $0x20] ss:$8 sps:$4 sm:$0xff]   ;;  %v369_v16 = vld [vmem:[%s503_s1 + $0x34] ss:$8 sps:$4 sm:$0xff]  }
   0x4   :  { %v41_v9 = vmul.f32 %v419_v2, %v419_v2  ;;  %v39_v10 = vmul.f32 %v421_v3, %v421_v3  ;;  %190 = vmatpush1.bf16.msra.mxu0 %v362_v7  ;;  %v42_v12 = vmul.f32 %v423_v4, %v423_v4  ;;  %v40_v13 = vmul.f32 %v425_v5, %v425_v5  ;;  %v371_v17 = vld [vmem:[%s503_s1 + $0x30] ss:$8 sps:$4 sm:$0xff]   ;;  %v372_v18 = vld [vmem:[%s503_s1 + $0x44] ss:$8 sps:$4 sm:$0xff]   ;;  %v374_v19 = vld [vmem:[%s503_s1 + $0x40] ss:$8 sps:$4 sm:$0xff]  }
   0x5   :  { %351 = vmatpush1.bf16.msra.mxu1 %v362_v7  ;;  %191 = vmatprep.subr.bf16.mxu0 %v363_v8  ;;  %v375_v20 = vld [vmem:[%s503_s1 + $0x54] ss:$8 sps:$4 sm:$0xff]   ;;  %v377_v21 = vld [vmem:[%s503_s1 + $0x50] ss:$8 sps:$4 sm:$0xff]   ;;  %v378_v22 = vld [vmem:[%s503_s1 + $0x64] ss:$8 sps:$4 sm:$0xff]  }
   0x6   :  { %47 = vadd.xlane.f32.xlu1 %v41_v9  ;;  %43 = vadd.xlane.f32.xlu0 %v39_v10  ;;  %v380_v24 = vld [vmem:[%s503_s1 + $0x60] ss:$8 sps:$4 sm:$0xff]   ;;  %v381_v25 = vld [vmem:[%s503_s1 + $0x74] ss:$8 sps:$4 sm:$0xff]   ;;  %v383_v26 = vld [vmem:[%s503_s1 + $0x70] ss:$8 sps:$4 sm:$0xff]  }
   0x7   :  { %344 = vmatprep.subr.bf16.mxu1 %v363_v8  ;;  %v309_v44 = vld [vmem:[%s504_s2] ss:$0 sm:$0xff] }
   0x8   :  { %192 = vmatpush1.bf16.msra.mxu0 %v365_v11 }
   0x9   :  { %352 = vmatpush1.bf16.msra.mxu1 %v365_v11  ;;  %193 = vmatprep.subr.bf16.mxu0 %v366_v14 }
   0xa   :  { %49 = vadd.xlane.f32.xlu1 %v42_v12  ;;  %45 = vadd.xlane.f32.xlu0 %v40_v13 }
   0xb   :  { %345 = vmatprep.subr.bf16.mxu1 %v366_v14 }
   0xc   :  { %194 = vmatpush1.bf16.msra.mxu0 %v368_v15 }
   0xd   :  { %353 = vmatpush1.bf16.msra.mxu1 %v368_v15  ;;  %195 = vmatprep.subr.bf16.mxu0 %v369_v16 }
   0xe   :  { %346 = vmatprep.subr.bf16.mxu1 %v369_v16 }
  0x10   :  { %196 = vmatpush1.bf16.msra.mxu0 %v371_v17 }
  0x11   :  { %354 = vmatpush1.bf16.msra.mxu1 %v371_v17  ;;  %197 = vmatprep.subr.bf16.mxu0 %v372_v18 }
  0x12   :  { %347 = vmatprep.subr.bf16.mxu1 %v372_v18 }
  0x14   :  { %198 = vmatpush1.bf16.msra.mxu0 %v374_v19 }
  0x15   :  { %355 = vmatpush1.bf16.msra.mxu1 %v374_v19  ;;  %199 = vmatprep.subr.bf16.mxu0 %v375_v20 }
  0x16   :  { %348 = vmatprep.subr.bf16.mxu1 %v375_v20 }
  0x18   :  { %200 = vmatpush1.bf16.msra.mxu0 %v377_v21 }
  0x19   :  { %356 = vmatpush1.bf16.msra.mxu1 %v377_v21  ;;  %201 = vmatprep.subr.bf16.mxu0 %v378_v22 }
  0x1a   :  { %349 = vmatprep.subr.bf16.mxu1 %v378_v22 }
  0x1c   :  { %202 = vmatpush1.bf16.msra.mxu0 %v380_v24 }
  0x1d   :  { %357 = vmatpush1.bf16.msra.mxu1 %v380_v24  ;;  %203 = vmatprep.subr.bf16.mxu0 %v381_v25 }
  0x1e   :  { %350 = vmatprep.subr.bf16.mxu1 %v381_v25 }
  0x20   :  { %204 = vmatpush1.bf16.msra.mxu0 %v383_v26 }
  0x21   :  { %358 = vmatpush1.bf16.msra.mxu1 %v383_v26 }
  0x93   :  { %v48_v27 = vpop.xlane.xlu1 %47  ;;  %v44_v28 = vpop.xlane.xlu0 %43 }
  0x94   :  { %v54_v29 = vmul.f32 0.0078125, %v48_v27  ;;  %v52_v30 = vmul.f32 0.0078125, %v44_v28 }
  0x96   :  { %v58_v31 = vadd.f32 1e-06, %v54_v29  ;;  %v56_v32 = vadd.f32 1e-06, %v52_v30 }
  0x97   :  { %v50_v33 = vpop.xlane.xlu1 %49  ;;  %v46_v34 = vpop.xlane.xlu0 %45 }
  0x98   :  { %384 = vrsqrt.f32 %v58_v31  ;;  %v55_v35 = vmul.f32 0.0078125, %v50_v33  ;;  %v53_v36 = vmul.f32 0.0078125, %v46_v34 }
  0x99   :  { %386 = vrsqrt.f32 %v56_v32 }
  0x9a   :  { %v59_v37 = vadd.f32 1e-06, %v55_v35  ;;  %v57_v38 = vadd.f32 1e-06, %v53_v36 }
  0x9c   :  { %388 = vrsqrt.f32 %v59_v37 }
  0x9d   :  { %390 = vrsqrt.f32 %v57_v38 }
  0xa2   :  { %v385_v39 = vpop.eup %384 }
  0xa3   :  { %v387_v40 = vpop.eup %386  ;;  %v66_v41 = vmul.f32 %v385_v39, %v419_v2 }
  0xa4   :  { %v64_v43 = vmul.f32 %v387_v40, %v421_v3 }
  0xa5   :  { %v77_v48 = vmul.f32 %v309_v44, %v66_v41 }
  0xa6   :  { %v389_v42 = vpop.eup %388  ;;  %v75_v50 = vmul.f32 %v309_v44, %v64_v43 }
  0xa7   :  { %v391_v45 = vpop.eup %390  ;;  %v67_v46 = vmul.f32 %v389_v42, %v423_v4 }
  0xa8   :  { %v65_v47 = vmul.f32 %v391_v45, %v425_v5 }
  0xa9   :  { %v78_v49 = vmul.f32 %v309_v44, %v67_v46 }
  0xaa   :  { %v76_v51 = vmul.f32 %v309_v44, %v65_v47 }
  0xab   :  { %v80_v52 = vpack.c.bf16 %v78_v49, %v77_v48 }
  0xac   :  { %v79_v53 = vpack.c.bf16 %v76_v51, %v75_v50 }
  0xad   :  { %232 = vmatmul.mubr.bf16.vlgmr.msra.gmra.mrb[0].mxu1 %v80_v52 }
  0xae   :  { %222 = vmatmul.mubr.bf16.vlgmr.msra.gmra.mrb[0].mxu0 %v79_v53 }
 0x180   :  { %v233_v54 = vpop.f32.mrb[0].mxu1 }
 0x181   :  { %v223_v55 = vpop.f32.mrb[0].mxu0  ;;  %v273_v56 = vmax.f32 %v233_v54, 0.0  ;;  %v235_v57 = vpop.f32.mrb[1].mxu1 }
 0x182   :  { %v269_v58 = vmax.f32 %v223_v55, 0.0  ;;  %v225_v59 = vpop.f32.mrb[1].mxu0  ;;  %v274_v60 = vmax.f32 %v235_v57, 0.0  ;;  %v237_v61 = vpop.f32.mrb[2].mxu1 }
 0x183   :  { %v270_v62 = vmax.f32 %v225_v59, 0.0  ;;  %v227_v63 = vpop.f32.mrb[2].mxu0  ;;  %v275_v0 = vmax.f32 %v237_v61, 0.0  ;;  %v239_v1 = vpop.f32.mrb[3].mxu1 }
 0x184   :  { %v332_v2 = vpack.c.bf16 %v274_v60, %v273_v56  ;;  %v271_v3 = vmax.f32 %v227_v63, 0.0  ;;  %v229_v4 = vpop.f32.mrb[3].mxu0  ;;  %v276_v5 = vmax.f32 %v239_v1, 0.0 }
 0x185   :  { %v330_v6 = vpack.c.bf16 %v270_v62, %v269_v58  ;;  %v272_v7 = vmax.f32 %v229_v4, 0.0 }
 0x186   :  { %303 = vst [vmem:[%s505_s3 + $0x10] sm:$0xff] %v332_v2  ;;  %v333_v8 = vpack.c.bf16 %v276_v5, %v275_v0 }
 0x187   :  { %301 = vst [vmem:[%s505_s3] sm:$0xff] %v330_v6  ;;  %v331_v9 = vpack.c.bf16 %v272_v7, %v271_v3 }
 0x188   :  { %304 = vst [vmem:[%s505_s3 + $0x18] sm:$0xff] %v333_v8 }
 0x189   :  { %302 = vst [vmem:[%s505_s3 + $0x8] sm:$0xff] %v331_v9 }

// kernel: t5_encoder_wrapper_forward.13
= control target key start
LH: loop header
LB: loop body
LE: loop exit
PB: predicated region body
PF: predicated region fallthrough
CT: control target
= control target key end

     0   :  { %s347_s1 = inlined_call_operand.vmem [shape: bf16[128,128], index: 1, kind: input, shape index: {}]   ;;  %s348_s0 = inlined_call_operand.vmem [shape: bf16[32,128], index: 0, kind: input, shape index: {}]   ;;  %s349_s2 = inlined_call_operand.vmem [shape: bf16[32,128], index: 2, kind: input, shape index: {}]   ;;  %s350_s3 = inlined_call_operand.vmem [shape: bf16[32,128], index: 3, kind: output, shape index: {}]  }
   0x1   :  { %v275_v0 = vld [vmem:[%s347_s1] sm:$0xff]   ;;  %v276_v1 = vld [vmem:[%s347_s1 + $0x8] sm:$0xff]   ;;  %v277_v2 = vld [vmem:[%s347_s1 + $0x10] sm:$0xff]  }
   0x2   :  { %255 = vmatprep.subr.bf16.mxu0 %v275_v0  ;;  %v278_v3 = vld [vmem:[%s347_s1 + $0x18] sm:$0xff]   ;;  %v283_v4 = vld [vmem:[%s348_s0] sm:$0xff]   ;;  %v280_v6 = vld [vmem:[%s347_s1 + $0x28] sm:$0xff]  }
   0x3   :  { %256 = vmatpush3.bf16.msra.mxu0 %v275_v0  ;;  %271 = vmatprep.mubr.bf16.mxu0 %v283_v4  ;;  %v279_v5 = vld [vmem:[%s347_s1 + $0x20] sm:$0xff]   ;;  %v281_v7 = vld [vmem:[%s347_s1 + $0x30] sm:$0xff]   ;;  %v282_v8 = vld [vmem:[%s347_s1 + $0x38] sm:$0xff]  }
   0x4   :  { %257 = vmatprep.subr.bf16.mxu0 %v276_v1  ;;  %v284_v9 = vld [vmem:[%s348_s0 + $0x8] sm:$0xff]   ;;  %v226_v11 = vld [vmem:[%s349_s2] sm:$0xff]  }
   0x5   :  { %v243_v10 = vld [vmem:[%s349_s2 + $0x8] sm:$0xff]   ;;  %v227_v15 = vunpack.c.l.bf16 %v226_v11  ;;  %v228_v16 = vunpack.c.h.bf16 %v226_v11 }
   0x6   :  { %v231_v12 = vunpack.c.l.bf16 %v243_v10  ;;  %v232_v13 = vunpack.c.h.bf16 %v243_v10 }
   0x7   :  { %258 = vmatpush3.bf16.msra.mxu0 %v276_v1 }
   0x8   :  { %259 = vmatprep.subr.bf16.mxu0 %v277_v2 }
   0xb   :  { %260 = vmatpush3.bf16.msra.mxu0 %v277_v2 }
   0xc   :  { %261 = vmatprep.subr.bf16.mxu0 %v278_v3 }
   0xf   :  { %262 = vmatpush3.bf16.msra.mxu0 %v278_v3 }
  0x10   :  { %263 = vmatprep.subr.bf16.mxu0 %v279_v5 }
  0x13   :  { %264 = vmatpush3.bf16.msra.mxu0 %v279_v5 }
  0x14   :  { %265 = vmatprep.subr.bf16.mxu0 %v280_v6 }
  0x17   :  { %266 = vmatpush3.bf16.msra.mxu0 %v280_v6 }
  0x18   :  { %267 = vmatprep.subr.bf16.mxu0 %v281_v7 }
  0x1b   :  { %268 = vmatpush3.bf16.msra.mxu0 %v281_v7 }
  0x1c   :  { %269 = vmatprep.subr.bf16.mxu0 %v282_v8 }
  0x1f   :  { %270 = vmatpush3.bf16.msra.mxu0 %v282_v8 }
  0x22   :  { %272 = vmatmul.mubr.bf16.vlgmr.msra.gmra.mrb[0].mxu0 %v284_v9 }
  0xf5   :  { %v273_v14 = vpop.f32.mrb[0].mxu0 }
  0xf6   :  { %v141_v17 = vpop.f32.mrb[1].mxu0  ;;  %v181_v19 = vadd.f32 %v273_v14, %v231_v12 }
  0xf7   :  { %v274_v18 = vpop.f32.mrb[2].mxu0  ;;  %v179_v22 = vadd.f32 %v227_v15, %v141_v17 }
  0xf8   :  { %v182_v20 = vadd.f32 %v274_v18, %v232_v13  ;;  %v144_v21 = vpop.f32.mrb[3].mxu0 }
  0xf9   :  { %v180_v23 = vadd.f32 %v228_v16, %v144_v21 }
  0xfa   :  { %v241_v24 = vpack.c.bf16 %v182_v20, %v181_v19 }
  0xfb   :  { %v236_v25 = vpack.c.bf16 %v180_v23, %v179_v22 }
  0xfc   :  { %244 = vst [vmem:[%s350_s3 + $0x8] sm:$0xff] %v241_v24  }
  0xfd   :  { %237 = vst [vmem:[%s350_s3] sm:$0xff] %v236_v25  }

// kernel: t5_encoder_wrapper_forward.11
= control target key start
LH: loop header
LB: loop body
LE: loop exit
PB: predicated region body
PF: predicated region fallthrough
CT: control target
= control target key end

     0   :  { %v575_v30 = vmov 0   ;;  %s721_s0 = inlined_call_operand.vmem [shape: bf16[32,128], index: 0, kind: input, shape index: {}]   ;;  %s722_s1 = inlined_call_operand.vmem [shape: bf16[128,384], index: 1, kind: input, shape index: {}]   ;;  %s723_s2 = inlined_call_operand.vmem [shape: f32[1,128], index: 2, kind: input, shape index: {}]   ;;  %s724_s3 = inlined_call_operand.vmem [shape: bf16[32,384], index: 3, kind: output, shape index: {}]  }
   0x1   :  { %v496_v0 = vld [vmem:[%s721_s0] sm:$0xff]   ;;  %v503_v1 = vld [vmem:[%s721_s0 + $0x8] sm:$0xff]   ;;  %v545_v17 = vld [vmem:[%s722_s1 + $0x30] ss:$12 sps:$4 sm:$0xff]   ;;  %293 = vmatprep.mubr.bf16.mxu0 %v575_v30 }
   0x2   :  { %v602_v2 = vunpack.c.l.bf16 %v496_v0  ;;  %v604_v3 = vunpack.c.l.bf16 %v503_v1  ;;  %v606_v4 = vunpack.c.h.bf16 %v496_v0  ;;  %v608_v5 = vunpack.c.h.bf16 %v503_v1  ;;  %v535_v6 = vld [vmem:[%s722_s1 + $0x4] ss:$12 sps:$4 sm:$0xff]   ;;  %v537_v7 = vld [vmem:[%s722_s1] ss:$12 sps:$4 sm:$0xff]   ;;  %v538_v8 = vld [vmem:[%s722_s1 + $0x8] ss:$12 sps:$4 sm:$0xff]  }
   0x3   :  { %261 = vmatprep.subr.bf16.mxu0 %v535_v6  ;;  %v539_v11 = vld [vmem:[%s722_s1 + $0x1c] ss:$12 sps:$4 sm:$0xff]   ;;  %514 = vmatprep.subr.bf16.mxu1 %v538_v8  ;;  %v541_v12 = vld [vmem:[%s722_s1 + $0x18] ss:$12 sps:$4 sm:$0xff]   ;;  %v542_v15 = vld [vmem:[%s722_s1 + $0x20] ss:$12 sps:$4 sm:$0xff]  }
   0x4   :  { %v43_v9 = vmul.f32 %v602_v2, %v602_v2  ;;  %v45_v10 = vmul.f32 %v604_v3, %v604_v3  ;;  %262 = vmatpush1.bf16.msra.mxu0 %v537_v7  ;;  %v44_v13 = vmul.f32 %v606_v4, %v606_v4  ;;  %v46_v14 = vmul.f32 %v608_v5, %v608_v5  ;;  %v543_v16 = vld [vmem:[%s722_s1 + $0x34] ss:$12 sps:$4 sm:$0xff]   ;;  %v546_v18 = vld [vmem:[%s722_s1 + $0x38] ss:$12 sps:$4 sm:$0xff]   ;;  %v550_v21 = vld [vmem:[%s722_s1 + $0x50] ss:$12 sps:$4 sm:$0xff]  }
   0x5   :  { %515 = vmatpush3.bf16.msra.mxu1 %v538_v8  ;;  %263 = vmatprep.subr.bf16.mxu0 %v539_v11  ;;  %v547_v19 = vld [vmem:[%s722_s1 + $0x4c] ss:$12 sps:$4 sm:$0xff]   ;;  %v549_v20 = vld [vmem:[%s722_s1 + $0x48] ss:$12 sps:$4 sm:$0xff]   ;;  %v551_v22 = vld [vmem:[%s722_s1 + $0x64] ss:$12 sps:$4 sm:$0xff]  }
   0x6   :  { %47 = vadd.xlane.f32.xlu0 %v43_v9  ;;  %51 = vadd.xlane.f32.xlu1 %v45_v10  ;;  %v553_v23 = vld [vmem:[%s722_s1 + $0x60] ss:$12 sps:$4 sm:$0xff]   ;;  %v554_v24 = vld [vmem:[%s722_s1 + $0x68] ss:$12 sps:$4 sm:$0xff]   ;;  %v557_v27 = vld [vmem:[%s722_s1 + $0x78] ss:$12 sps:$4 sm:$0xff]  }
   0x7   :  { %516 = vmatprep.subr.bf16.mxu1 %v542_v15  ;;  %v555_v25 = vld [vmem:[%s722_s1 + $0x7c] ss:$12 sps:$4 sm:$0xff]   ;;  %v558_v26 = vld [vmem:[%s722_s1 + $0x80] ss:$12 sps:$4 sm:$0xff]   ;;  %v562_v29 = vld [vmem:[%s722_s1 + $0x98] ss:$12 sps:$4 sm:$0xff]  }
   0x8   :  { %264 = vmatpush1.bf16.msra.mxu0 %v541_v12  ;;  %v559_v28 = vld [vmem:[%s722_s1 + $0x94] ss:$12 sps:$4 sm:$0xff]   ;;  %v561_v31 = vld [vmem:[%s722_s1 + $0x90] ss:$12 sps:$4 sm:$0xff]   ;;  %v563_v32 = vld [vmem:[%s722_s1 + $0xac] ss:$12 sps:$4 sm:$0xff]  }
   0x9   :  { %517 = vmatpush3.bf16.msra.mxu1 %v542_v15  ;;  %265 = vmatprep.subr.bf16.mxu0 %v543_v16  ;;  %v566_v33 = vld [vmem:[%s722_s1 + $0xb0] ss:$12 sps:$4 sm:$0xff]   ;;  %v565_v34 = vld [vmem:[%s722_s1 + $0xa8] ss:$12 sps:$4 sm:$0xff]   ;;  %v454_v52 = vld [vmem:[%s723_s2] ss:$0 sm:$0xff] }
   0xa   :  { %49 = vadd.xlane.f32.xlu0 %v44_v13  ;;  %53 = vadd.xlane.f32.xlu1 %v46_v14 }
   0xb   :  { %518 = vmatprep.subr.bf16.mxu1 %v546_v18 }
   0xc   :  { %266 = vmatpush1.bf16.msra.mxu0 %v545_v17 }
   0xd   :  { %519 = vmatpush3.bf16.msra.mxu1 %v546_v18  ;;  %267 = vmatprep.subr.bf16.mxu0 %v547_v19 }
   0xe   :  { %520 = vmatprep.subr.bf16.mxu1 %v550_v21 }
  0x10   :  { %268 = vmatpush1.bf16.msra.mxu0 %v549_v20 }
  0x11   :  { %521 = vmatpush3.bf16.msra.mxu1 %v550_v21  ;;  %269 = vmatprep.subr.bf16.mxu0 %v551_v22 }
  0x12   :  { %522 = vmatprep.subr.bf16.mxu1 %v554_v24 }
  0x14   :  { %270 = vmatpush1.bf16.msra.mxu0 %v553_v23 }
  0x15   :  { %523 = vmatpush3.bf16.msra.mxu1 %v554_v24  ;;  %271 = vmatprep.subr.bf16.mxu0 %v555_v25 }
  0x16   :  { %524 = vmatprep.subr.bf16.mxu1 %v558_v26 }
  0x18   :  { %272 = vmatpush1.bf16.msra.mxu0 %v557_v27 }
  0x19   :  { %525 = vmatpush3.bf16.msra.mxu1 %v558_v26  ;;  %273 = vmatprep.subr.bf16.mxu0 %v559_v28 }
  0x1a   :  { %526 = vmatprep.subr.bf16.mxu1 %v562_v29 }
  0x1c   :  { %274 = vmatpush1.bf16.msra.mxu0 %v561_v31 }
  0x1d   :  { %527 = vmatpush3.bf16.msra.mxu1 %v562_v29  ;;  %275 = vmatprep.subr.bf16.mxu0 %v563_v32 }
  0x1e   :  { %528 = vmatprep.subr.bf16.mxu1 %v566_v33 }
  0x20   :  { %276 = vmatpush1.bf16.msra.mxu0 %v565_v34 }
  0x21   :  { %529 = vmatpush3.bf16.msra.mxu1 %v566_v33 }
  0x93   :  { %v48_v35 = vpop.xlane.xlu0 %47  ;;  %v52_v36 = vpop.xlane.xlu1 %51 }
  0x94   :  { %v56_v37 = vmul.f32 0.0078125, %v48_v35  ;;  %v58_v38 = vmul.f32 0.0078125, %v52_v36 }
  0x96   :  { %v60_v39 = vadd.f32 1e-06, %v56_v37  ;;  %v62_v40 = vadd.f32 1e-06, %v58_v38 }
  0x97   :  { %v50_v41 = vpop.xlane.xlu0 %49  ;;  %v54_v42 = vpop.xlane.xlu1 %53 }
  0x98   :  { %567 = vrsqrt.f32 %v60_v39  ;;  %v57_v43 = vmul.f32 0.0078125, %v50_v41  ;;  %v59_v44 = vmul.f32 0.0078125, %v54_v42 }
  0x99   :  { %569 = vrsqrt.f32 %v62_v40 }
  0x9a   :  { %v61_v45 = vadd.f32 1e-06, %v57_v43  ;;  %v63_v46 = vadd.f32 1e-06, %v59_v44 }
  0x9c   :  { %571 = vrsqrt.f32 %v61_v45 }
  0x9d   :  { %573 = vrsqrt.f32 %v63_v46 }
  0xa2   :  { %v568_v47 = vpop.eup %567 }
  0xa3   :  { %v570_v48 = vpop.eup %569  ;;  %v68_v50 = vmul.f32 %v568_v47, %v602_v2 }
  0xa4   :  { %v70_v49 = vmul.f32 %v570_v48, %v604_v3 }
  0xa5   :  { %v79_v57 = vmul.f32 %v454_v52, %v68_v50 }
  0xa6   :  { %v572_v51 = vpop.eup %571  ;;  %v81_v56 = vmul.f32 %v454_v52, %v70_v49 }
  0xa7   :  { %v574_v53 = vpop.eup %573  ;;  %v69_v54 = vmul.f32 %v572_v51, %v606_v4 }
  0xa8   :  { %v71_v55 = vmul.f32 %v574_v53, %v608_v5 }
  0xa9   :  { %v80_v58 = vmul.f32 %v454_v52, %v69_v54 }
  0xaa   :  { %v82_v59 = vmul.f32 %v454_v52, %v71_v55 }
  0xab   :  { %v83_v60 = vpack.c.bf16 %v80_v58, %v79_v57 }
  0xac   :  { %v84_v61 = vpack.c.bf16 %v82_v59, %v81_v56 }
  0xad   :  { %294 = vmatmul.mubr.bf16.vlgmr.msra.gmra.mrb[0].mxu0 %v83_v60  ;;  %530 = vmatprep.mubr.bf16.mxu1 %v83_v60 }
  0xae   :  { %531 = vmatmul.mubr.bf16.vlgmr.msra.gmra.mrb[0].mxu1 %v84_v61  ;;  %303 = vmatprep.mubr.bf16.mxu0 %v575_v30 }
  0xb5   :  { %304 = vmatmul.mubr.bf16.gmra.mrb[4].mxu0 %v84_v61 }
 0x180   :  { %v295_v62 = vpop.f32.mrb[0].mxu0 }
 0x181   :  { %v297_v63 = vpop.f32.mrb[1].mxu0  ;;  %v532_v0 = vpop.f32.mrb[0].mxu1 }
 0x182   :  { %v487_v1 = vpack.c.bf16 %v297_v63, %v295_v62  ;;  %v492_v2 = vpack.c.bf16 %v532_v0, %v532_v0  ;;  %v299_v3 = vpop.f32.mrb[2].mxu0  ;;  %v348_v4 = vpop.f32.mrb[1].mxu1 }
 0x183   :  { %v488_v6 = vpack.c.bf16 %v348_v4, %v348_v4  ;;  %v301_v5 = vpop.f32.mrb[3].mxu0  ;;  %v533_v7 = vpop.f32.mrb[2].mxu1 }
 0x184   :  { %442 = vst [vmem:[%s724_s3] sm:$0xff] %v487_v1  ;;  %447 = vst [vmem:[%s724_s3 + $0x20] sm:$0xf] %v492_v2  ;;  %v489_v8 = vpack.c.bf16 %v301_v5, %v299_v3  ;;  %v494_v9 = vpack.c.bf16 %v533_v7, %v533_v7  ;;  %v351_v10 = vpop.f32.mrb[3].mxu1 }
 0x185   :  { %443 = vst [vmem:[%s724_s3 + $0x8] sm:$0xf] %v488_v6  ;;  %v490_v11 = vpack.c.bf16 %v351_v10, %v351_v10 }
 0x186   :  { %444 = vst [vmem:[%s724_s3 + $0xc] sm:$0xff] %v489_v8  ;;  %449 = vst [vmem:[%s724_s3 + $0x2c] sm:$0xf] %v494_v9 }
 0x187   :  { %445 = vst [vmem:[%s724_s3 + $0x14] sm:$0xf] %v490_v11 }
 0x188   :  { %v305_v12 = vpop.f32.mrb[4].mxu0 }
 0x189   :  { %v307_v13 = vpop.f32.mrb[5].mxu0 }
 0x18a   :  { %v491_v14 = vpack.c.bf16 %v307_v13, %v305_v12  ;;  %v309_v15 = vpop.f32.mrb[6].mxu0 }
 0x18b   :  { %v311_v16 = vpop.f32.mrb[7].mxu0 }
 0x18c   :  { %446 = vst [vmem:[%s724_s3 + $0x18] sm:$0xff] %v491_v14  ;;  %v493_v17 = vpack.c.bf16 %v311_v16, %v309_v15 }
 0x18e   :  { %448 = vst [vmem:[%s724_s3 + $0x24] sm:$0xff] %v493_v17 }

// kernel: t5_encoder_wrapper_forward.12
= control target key start
LH: loop header
LB: loop body
LE: loop exit
PB: predicated region body
PF: predicated region fallthrough
CT: control target
= control target key end

     0   :  { %s946_s12 = smov 0   ;;  %s1067_s0 = inlined_call_operand.vmem [shape: bf16[4,8,384], index: 0, kind: input, shape index: {}]   ;;  %s1068_s1 = inlined_call_operand.vmem [shape: bf16[4,8,8], index: 1, kind: input, shape index: {}]   ;;  %s1069_s2 = inlined_call_operand.vmem [shape: f32[4,1,8], index: 2, kind: input, shape index: {}]   ;;  %s1070_s3 = inlined_call_operand.vmem [shape: bf16[4,8,128], index: 3, kind: output, shape index: {}]  }
   0x1 LB: > { %s774_s13 = sadd.s32 4294967295, %s919_s12   ;;  %p778_p0 = scmp.ge.s32.totalorder %s919_s12, 1  ;;  %s919_s12 = sphi %s946_s12, %s13_s12  }
   0x2   : > { %p145_p1 = scmp.lt.s32.totalorder %s919_s12, 5 }
   0x4   : > { %p146_p2 = pnand %p778_p0, %p145_p1 }
   0x5   : > { %p171_p3 = scmp.lt.s32.totalorder (!%p146_p2), %s774_s13, 3  ;;  %v921_v0 = vmov (!%p146_p2), 0.0   ;;  %vm922_vm0 = vmmov (!%p146_p2), 0   ;;  %vm190_vm1 = vcmask (!%p146_p2), 261120   ;;  %v978_v4 = vld [vmem:[%s1068_s1] sm:$0xff] (!%p146_p2)   ;;  %vm244_vm2 = vcmask (!%p146_p2), 64512  }
   0x6   : > { %149 = sbr.rel (%p146_p2) target bundleno = 1481 (0x5c9), region = 32  ;;  %826 = vmatprep.subr.bf16.mxu0 (!%p146_p2), %v921_v0  ;;  %828 = vmatprep.mubr.msk.bf16.mxu0 (!%p146_p2), %vm922_vm0, %v921_v0  ;;  %v189_v5 = vunpack.c.l.bf16 (!%p146_p2), %v978_v4  ;;  %s923_s23 = smov (!%p146_p2), 96   ;;  %vm260_vm3 = vcmask (!%p146_p2), 1043456   ;;  %vm305_vm4 = vcmask (!%p146_p2), 257024   ;;  %v312_v45 = vunpack.c.h.bf16 (!%p146_p2), %v978_v4  ;;  %v791_v50 = vld [vmem:[%s1068_s1 + $0x8] sm:$0xff] (!%p146_p2)  }
   0x7   : > { %832 = vmatprep.subr.bf16.mxu1 (!%p146_p2), %v921_v0  ;;  %834 = vmatprep.mubr.msk.bf16.mxu1 (!%p146_p2), %vm922_vm0, %v921_v0  ;;  %s924_s24 = smov (!%p146_p2), 64   ;;  %s925_s25 = smov (!%p146_p2), 32   ;;  %v447_v54 = vunpack.c.l.bf16 (!%p146_p2), %v791_v50  ;;  %v582_v62 = vunpack.c.h.bf16 (!%p146_p2), %v791_v50  ;;  %vm440_vm5 = vcmask (!%p146_p2), 519424   ;;  %vm575_vm6 = vcmask (!%p146_p2), 781824  }
   0x8   : > { %vm710_vm7 = vcmask (!%p146_p2), 1044224  }
   0xd   : > { %s1072_s13 = smov (!%p171_p3, %s774_s13), 3 }
   0xe   : > { %s874_s14 = smul.u32 12, %s1072_s13  ;;  %s178_s22 = scalar_lea.vmem %s1069_s2, %s1072_s13 }
   0xf   : > { %v985_v7 = vld [vmem:[%s178_s22] ss:$0 sm:$0xff]  ;;  %s780_s26 = sshll.u32 %s1072_s13, 2 }
  0x10   : > { %s966_s17 = scalar_lea.vmem %s1067_s0, %s874_s14  ;;  %s1024_s29 = scalar_lea.vmem %s1070_s3, %s780_s26 }
  0x11   : > { %v186_v1 = vld [vmem:[%s966_s17 + $0x4] sm:$0xf]  ;;  %v185_v3 = vld [vmem:[%s966_s17] sm:$0xf]  ;;  %v187_v24 = vld [vmem:[%s966_s17 + $0x8] sm:$0xf] }
  0x12   : > { %v195_v2 = vsel %vm190_vm1, %v186_v1, 0  ;;  %v888_v14 = vld [vmem:[%s966_s17 + $0x4] ss:$0 sps:$4 sm:$0xff]   ;;  %v889_v15 = vld [vmem:[%s966_s17] ss:$0 sps:$4 sm:$0xff]   ;;  %v262_v25 = vsel %vm260_vm3, %v187_v24, 0 }
  0x13   : > { %827 = vmatpush3.bf16.xpose.msra.mxu0 %v195_v2  ;;  %321 = vrot.lane.b32.xlu1 %v888_v14, %s923_s23  ;;  %v891_v16 = vld [vmem:[%s966_s17] ss:$0 sps:$4 sm:$0xff]   ;;  %v892_v17 = vld [vmem:[%s966_s17 + $0x4] ss:$0 sps:$4 sm:$0xff]   ;;  %v896_v24 = vld [vmem:[%s966_s17 + $0x8] ss:$0 sps:$4 sm:$0xff]  }
  0x14   : > { %844 = vmatprep.subr.bf16.mxu0 %v921_v0  ;;  %v893_v18 = vld [vmem:[%s966_s17] ss:$0 sps:$4 sm:$0xff]   ;;  %833 = vmatpush3.bf16.msra.mxu1 %v262_v25  ;;  %v890_v26 = vld [vmem:[%s966_s17 + $0x4] ss:$0 sps:$4 sm:$0xff]  }
  0x15   : > { %838 = vmatprep.subr.bf16.mxu1 %v921_v0 }
  0x17   : > { %316 = vrot.lane.b32.xlu1 %v889_v15, %s923_s23 }
  0x1a   : > { %829 = vmatmul.mubr.msk.bf16.vlgmr.msra.gmra.mrb[0].mxu0 %vm190_vm1, %v185_v3 }
  0x1b   : > { %846 = vmatprep.mubr.msk.bf16.mxu0 %vm922_vm0, %v921_v0  ;;  %451 = vrot.lane.b32.xlu1 %v891_v16, %s924_s24 }
  0x1f   : > { %591 = vrot.lane.b32.xlu1 %v892_v17, %s925_s25  ;;  %v894_v17 = vld [vmem:[%s966_s17 + $0x8] ss:$0 sps:$4 sm:$0xff]  }
  0x23   : > { %586 = vrot.lane.b32.xlu1 %v893_v18, %s925_s25  ;;  %v895_v18 = vld [vmem:[%s966_s17 + $0x8] ss:$0 sps:$4 sm:$0xff]  }
  0x85   : > { %v322_v29 = vpop.permute.xlu1 %321 }
  0x86   : > { %v327_v31 = vsel %vm190_vm1, %v322_v29, 0 }
  0x89   : > { %v317_v33 = vpop.permute.xlu1 %316 }
  0x8d   : > { %v452_v35 = vpop.permute.xlu1 %451 }
  0x91   : > { %v592_v37 = vpop.permute.xlu1 %591 }
  0x92   : > { %v597_v38 = vsel %vm190_vm1, %v592_v37, 0 }
  0x95   : > { %v587_v39 = vpop.permute.xlu1 %586 }
  0xed   : > { %v231_v6 = vpop.f32.mrb[0].mxu0 }
  0xee   : > { %v232_v8 = vadd.f32 %v231_v6, %v189_v5  ;;  %v830_v9 = vpop.f32.mrb[1].mxu0 }
  0xef   : > { %v234_v10 = vpop.f32.mrb[2].mxu0 }
  0xf0   : > { %v831_v11 = vpop.f32.mrb[3].mxu0  ;;  %v243_v12 = vadd.f32 %v985_v7, %v232_v8 }
  0xf2   : > { %v245_v13 = vsel %vm244_vm2, %v243_v12, -inf }
  0xf3   : > { %246 = vmax.xlane.f32.xlu0 %v245_v13 }
 0x180   : > { %v247_v19 = vpop.xlane.xlu0 %246 }
 0x181   : > { %v248_v20 = vsub.f32 %v243_v12, %v247_v19 }
 0x183   : > { %v249_v21 = vmul.f32 1.442695, %v248_v20 }
 0x185   : > { %897 = vpow2.f32 %v249_v21 }
 0x18f   : > { %v898_v22 = vpop.eup %897 }
 0x190   : > { %v251_v23 = vsel %vm244_vm2, %v898_v22, 0.0 }
 0x191   : > { %252 = vadd.xlane.f32.xlu0 %v251_v23 }
 0x1a7   : > { %456 = vrot.lane.b32.xlu0 %v890_v26, %s924_s24 }
 0x21e   : > { %v253_v27 = vpop.xlane.xlu0 %252 }
 0x21f   : > { %899 = vrcp.f32 %v253_v27 }
 0x222   : > { %v457_v34 = vpop.permute.xlu0 %456 }
 0x223   : > { %v462_v36 = vsel %vm190_vm1, %v457_v34, 0 }
 0x229   : > { %v900_v28 = vpop.eup %899 }
 0x22a   : > { %v255_v30 = vmul.f32 %v900_v28, %v898_v22 }
 0x22c   : > { %v256_v32 = vpack.c.bf16 %v255_v30, %v255_v30 }
 0x22e   : > { %835 = vmatmul.mubr.msk.bf16.vlgmr.msra.gmra.mrb[0].mxu1 %vm244_vm2, %v256_v32 }
 0x22f   : > { %839 = vmatpush3.bf16.xpose.msra.mxu1 %v327_v31  ;;  %840 = vmatprep.mubr.msk.bf16.mxu1 %vm922_vm0, %v921_v0 }
 0x230   : > { %850 = vmatprep.subr.bf16.mxu1 %v921_v0 }
 0x236   : > { %841 = vmatmul.mubr.msk.bf16.vlgmr.msra.gmra.mrb[4].mxu1 %vm190_vm1, %v317_v33 }
 0x237   : > { %851 = vmatpush3.bf16.xpose.msra.mxu1 %v462_v36  ;;  %852 = vmatprep.mubr.msk.bf16.mxu1 %vm922_vm0, %v921_v0 }
 0x238   : > { %862 = vmatprep.subr.bf16.mxu1 %v921_v0 }
 0x23e   : > { %853 = vmatmul.mubr.msk.bf16.vlgmr.msra.gmra.mrb[8].mxu1 %vm190_vm1, %v452_v35 }
 0x23f   : > { %863 = vmatpush3.bf16.xpose.msra.mxu1 %v597_v38  ;;  %864 = vmatprep.mubr.msk.bf16.mxu1 %vm922_vm0, %v921_v0 }
 0x246   : > { %865 = vmatmul.mubr.msk.bf16.vlgmr.msra.gmra.mrb[12].mxu1 %vm190_vm1, %v587_v39 }
 0x301   : > { %v298_v40 = vpop.f32.mrb[0].mxu1 }
 0x302   : > { %v304_v41 = vpack.c.bf16 %v298_v40, %v298_v40  ;;  %v836_v42 = vpop.f32.mrb[1].mxu1 }
 0x303   : > { %v301_v43 = vpop.f32.mrb[2].mxu1 }
 0x304   : > { %306 = vst.msk [vmem:[%s1024_s29] sm:$0xf] %vm305_vm4, %v304_v41  ;;  %v837_v44 = vpop.f32.mrb[3].mxu1 }
 0x309   : > { %v363_v46 = vpop.f32.mrb[4].mxu1 }
 0x30a   : > { %v364_v47 = vadd.f32 %v363_v46, %v312_v45  ;;  %v842_v48 = vpop.f32.mrb[5].mxu1 }
 0x30b   : > { %v366_v49 = vpop.f32.mrb[6].mxu1 }
 0x30c   : > { %v843_v51 = vpop.f32.mrb[7].mxu1  ;;  %v369_v52 = vadd.f32 %v985_v7, %v364_v47 }
 0x30e   : > { %v370_v53 = vsel %vm244_vm2, %v369_v52, -inf }
 0x30f   : > { %371 = vmax.xlane.f32.xlu1 %v370_v53 }
 0x311   : > { %v498_v55 = vpop.f32.mrb[8].mxu1 }
 0x312   : > { %v499_v56 = vadd.f32 %v498_v55, %v447_v54  ;;  %v854_v57 = vpop.f32.mrb[9].mxu1 }
 0x313   : > { %v501_v58 = vpop.f32.mrb[10].mxu1 }
 0x314   : > { %v504_v59 = vadd.f32 %v985_v7, %v499_v56  ;;  %v855_v60 = vpop.f32.mrb[11].mxu1 }
 0x316   : > { %v505_v61 = vsel %vm244_vm2, %v504_v59, -inf }
 0x317   : > { %506 = vmax.xlane.f32.xlu0 %v505_v61 }
 0x319   : > { %v633_v63 = vpop.f32.mrb[12].mxu1 }
 0x31a   : > { %v634_v1 = vadd.f32 %v633_v63, %v582_v62  ;;  %v866_v2 = vpop.f32.mrb[13].mxu1 }
 0x31b   : > { %v636_v3 = vpop.f32.mrb[14].mxu1 }
 0x31c   : > { %v639_v4 = vadd.f32 %v985_v7, %v634_v1  ;;  %v867_v5 = vpop.f32.mrb[15].mxu1 }
 0x31e   : > { %v640_v6 = vsel %vm244_vm2, %v639_v4, -inf }
 0x31f   : > { %641 = vmax.xlane.f32.xlu1 %v640_v6 }
 0x39c   : > { %v372_v8 = vpop.xlane.xlu1 %371 }
 0x39d   : > { %v373_v9 = vsub.f32 %v369_v52, %v372_v8 }
 0x39f   : > { %v374_v10 = vmul.f32 1.442695, %v373_v9 }
 0x3a1   : > { %901 = vpow2.f32 %v374_v10 }
 0x3a4   : > { %v507_v11 = vpop.xlane.xlu0 %506 }
 0x3a5   : > { %v508_v12 = vsub.f32 %v504_v59, %v507_v11 }
 0x3a7   : > { %v509_v13 = vmul.f32 1.442695, %v508_v12 }
 0x3a9   : > { %903 = vpow2.f32 %v509_v13 }
 0x3ab   : > { %v902_v14 = vpop.eup %901 }
 0x3ac   : > { %v376_v15 = vsel %vm244_vm2, %v902_v14, 0.0  ;;  %v642_v19 = vpop.xlane.xlu1 %641 }
 0x3ad   : > { %377 = vadd.xlane.f32.xlu1 %v376_v15  ;;  %v643_v20 = vsub.f32 %v639_v4, %v642_v19 }
 0x3af   : > { %v644_v21 = vmul.f32 1.442695, %v643_v20 }
 0x3b1   : > { %905 = vpow2.f32 %v644_v21 }
 0x3b3   : > { %v904_v7 = vpop.eup %903 }
 0x3b4   : > { %v511_v16 = vsel %vm244_vm2, %v904_v7, 0.0 }
 0x3b5   : > { %512 = vadd.xlane.f32.xlu0 %v511_v16 }
 0x3bb   : > { %v906_v22 = vpop.eup %905 }
 0x3bc   : > { %v646_v23 = vsel %vm244_vm2, %v906_v22, 0.0 }
 0x3be   : > { %520 = vrot.lane.b32.xlu1 %v894_v17, %s924_s24 }
 0x3cb   : > { %385 = vrot.lane.b32.xlu0 %v895_v18, %s923_s23 }
 0x3e2   : > { %647 = vadd.xlane.f32.xlu1 %v646_v23 }
 0x3f3   : > { %655 = vrot.lane.b32.xlu1 %v896_v24, %s925_s25 }
 0x43a   : > { %v378_v25 = vpop.xlane.xlu1 %377 }
 0x43b   : > { %907 = vrcp.f32 %v378_v25 }
 0x43e   : > { %v521_v31 = vpop.permute.xlu1 %520 }
 0x43f   : > { %v526_v33 = vsel %vm260_vm3, %v521_v31, 0 }
 0x442   : > { %v513_v26 = vpop.xlane.xlu0 %512 }
 0x443   : > { %909 = vrcp.f32 %v513_v26 }
 0x445   : > { %v908_v27 = vpop.eup %907 }
 0x446   : > { %v380_v28 = vmul.f32 %v908_v27, %v902_v14  ;;  %v386_v29 = vpop.permute.xlu0 %385 }
 0x447   : > { %v391_v30 = vsel %vm260_vm3, %v386_v29, 0 }
 0x448   : > { %845 = vmatpush3.bf16.msra.mxu0 %v391_v30  ;;  %v381_v32 = vpack.c.bf16 %v380_v28, %v380_v28 }
 0x449   : > { %856 = vmatprep.subr.bf16.mxu0 %v921_v0 }
 0x44b   : > { %847 = vmatmul.mubr.msk.bf16.vlgmr.msra.gmra.mrb[4].mxu0 %vm244_vm2, %v381_v32 }
 0x44c   : > { %857 = vmatpush3.bf16.msra.mxu0 %v526_v33  ;;  %858 = vmatprep.mubr.msk.bf16.mxu0 %vm922_vm0, %v921_v0 }
 0x44d   : > { %v910_v34 = vpop.eup %909  ;;  %868 = vmatprep.subr.bf16.mxu0 %v921_v0 }
 0x44e   : > { %v515_v35 = vmul.f32 %v910_v34, %v904_v7 }
 0x450   : > { %v516_v36 = vpack.c.bf16 %v515_v35, %v515_v35 }
 0x453   : > { %859 = vmatmul.mubr.msk.bf16.vlgmr.msra.gmra.mrb[8].mxu0 %vm244_vm2, %v516_v36 }
 0x454   : > { %870 = vmatprep.mubr.msk.bf16.mxu0 %vm922_vm0, %v921_v0 }
 0x46f   : > { %v648_v37 = vpop.xlane.xlu1 %647 }
 0x470   : > { %911 = vrcp.f32 %v648_v37 }
 0x473   : > { %v656_v38 = vpop.permute.xlu1 %655 }
 0x474   : > { %v661_v39 = vsel %vm260_vm3, %v656_v38, 0 }
 0x475   : > { %869 = vmatpush3.bf16.msra.mxu0 %v661_v39 }
 0x47a   : > { %v912_v40 = vpop.eup %911 }
 0x47b   : > { %v650_v41 = vmul.f32 %v912_v40, %v906_v22 }
 0x47d   : > { %v651_v42 = vpack.c.bf16 %v650_v41, %v650_v41 }
 0x47f   : > { %871 = vmatmul.mubr.msk.bf16.vlgmr.msra.gmra.mrb[12].mxu0 %vm244_vm2, %v651_v42 }
 0x51e   : > { %v427_v43 = vpop.f32.mrb[4].mxu0 }
 0x51f   : > { %v807_v44 = vpack.c.bf16 %v427_v43, %v427_v43  ;;  %v848_v45 = vpop.f32.mrb[5].mxu0 }
 0x520   : > { %v430_v46 = vpop.f32.mrb[6].mxu0 }
 0x521   : > { %437 = vrot.lane.b32.xlu0 %v807_v44, %s925_s25  ;;  %v849_v47 = vpop.f32.mrb[7].mxu0 }
 0x526   : > { %v562_v0 = vpop.f32.mrb[8].mxu0 }
 0x527   : > { %v808_v48 = vpack.c.bf16 %v562_v0, %v562_v0  ;;  %v860_v49 = vpop.f32.mrb[9].mxu0 }
 0x528   : > { %v565_v50 = vpop.f32.mrb[10].mxu0 }
 0x529   : > { %572 = vrot.lane.b32.xlu1 %v808_v48, %s924_s24  ;;  %v861_v51 = vpop.f32.mrb[11].mxu0 }
 0x552   : > { %v697_v52 = vpop.f32.mrb[12].mxu0 }
 0x553   : > { %v809_v53 = vpack.c.bf16 %v697_v52, %v697_v52  ;;  %v872_v54 = vpop.f32.mrb[13].mxu0 }
 0x554   : > { %v700_v55 = vpop.f32.mrb[14].mxu0 }
 0x555   : > { %707 = vrot.lane.b32.xlu0 %v809_v53, %s923_s23  ;;  %v873_v56 = vpop.f32.mrb[15].mxu0 }
 0x593   : > { %v438_v57 = vpop.permute.xlu0 %437 }
 0x594   : > { %441 = vst.msk [vmem:[%s1024_s29] sm:$0xf] %vm440_vm5, %v438_v57 }
 0x59b   : > { %v573_v58 = vpop.permute.xlu1 %572 }
 0x59c   : > { %576 = vst.msk [vmem:[%s1024_s29] sm:$0xf] %vm575_vm6, %v573_v58 }
 0x5c7   : > { %v708_v59 = vpop.permute.xlu0 %707 }
 0x5c8   : > { %711 = vst.msk [vmem:[%s1024_s29] sm:$0xf] %vm710_vm7, %v708_v59 }
 0x5c9 PF: > { %s13_s12 = sadd.s32 1, %s919_s12  }
 0x5ca   : > { %p10_p4 = scmp.ge.s32.totalorder %s13_s12, 6  }
 0x5cc   :  { %12 = sbr.rel (!%p10_p4) target bundleno = 1 (0x1), region = 68 }

// kernel: t5_encoder_wrapper_forward.21
= control target key start
LH: loop header
LB: loop body
LE: loop exit
PB: predicated region body
PF: predicated region fallthrough
CT: control target
= control target key end

     0   :  { %s164_s0 = inlined_call_operand.vmem [shape: bf16[32,128], index: 0, kind: input, shape index: {}]   ;;  %s165_s1 = inlined_call_operand.vmem [shape: f32[1,128], index: 1, kind: input, shape index: {}]   ;;  %s166_s2 = inlined_call_operand.hbm [shape: f32[32,128], index: 2, kind: output, shape index: {}]  }
   0x1   :  { %v89_v0 = vld [vmem:[%s164_s0 + $0x8] sm:$0xff]   ;;  %v82_v1 = vld [vmem:[%s164_s0] sm:$0xff]  }
   0x2   :  { %v87_v2 = vunpack.c.l.bf16 %v89_v0  ;;  %v83_v3 = vunpack.c.l.bf16 %v82_v1  ;;  %v88_v4 = vunpack.c.h.bf16 %v89_v0  ;;  %v84_v5 = vunpack.c.h.bf16 %v82_v1 }
   0x3   :  { %7 = vsyncpa [#allocation3], 0  ;;  %v80_v23 = vld [vmem:[%s165_s1] ss:$0 sm:$0xff]  ;;  %s125_s14 = smov [#allocation2]  }
   0x4   :  { %v22_v6 = vmul.f32 %v87_v2, %v87_v2  ;;  %v20_v7 = vmul.f32 %v83_v3, %v83_v3  ;;  %v23_v8 = vmul.f32 %v88_v4, %v88_v4  ;;  %v21_v9 = vmul.f32 %v84_v5, %v84_v5  ;;  %s69_s15 = sshll.u32 %s125_s14, 4  ;;  %s70_s15 = int_to_ptr.vmem [resolvable:$true] %s69_s15 }
   0x5   :  { %s101_s16 = scalar_lea.vmem %s70_s15, 512  ;;  %p106_p1 = scmp.lt.s32.totalorder %s70_s15, %s70_s15 }
   0x6   :  { %28 = vadd.xlane.f32.xlu1 %v22_v6  ;;  %24 = vadd.xlane.f32.xlu0 %v20_v7  ;;  %p102_p0 = scmp.ne.s32.totalorder %s70_s15, %s101_s16  ;;  %p107_p2 = scmp.lt.s32.totalorder %s101_s16, %s101_s16 }
   0x8   :  { %p108_p3 = por %p107_p2, %p106_p1 }
   0xa   :  { %30 = vadd.xlane.f32.xlu1 %v23_v8  ;;  %26 = vadd.xlane.f32.xlu0 %v21_v9  ;;  %p109_p4 = pnand %p108_p3, %p102_p0 }
  0x93   :  { %v29_v10 = vpop.xlane.xlu1 %28  ;;  %v25_v11 = vpop.xlane.xlu0 %24 }
  0x94   :  { %v35_v12 = vmul.f32 0.0078125, %v29_v10  ;;  %v33_v13 = vmul.f32 0.0078125, %v25_v11 }
  0x96   :  { %v39_v14 = vadd.f32 1e-06, %v35_v12  ;;  %v37_v15 = vadd.f32 1e-06, %v33_v13 }
  0x97   :  { %v31_v16 = vpop.xlane.xlu1 %30  ;;  %v27_v17 = vpop.xlane.xlu0 %26 }
  0x98   :  { %93 = vrsqrt.f32 %v39_v14  ;;  %v36_v18 = vmul.f32 0.0078125, %v31_v16  ;;  %v34_v19 = vmul.f32 0.0078125, %v27_v17 }
  0x99   :  { %95 = vrsqrt.f32 %v37_v15 }
  0x9a   :  { %v40_v20 = vadd.f32 1e-06, %v36_v18  ;;  %v38_v21 = vadd.f32 1e-06, %v34_v19 }
  0x9c   :  { %97 = vrsqrt.f32 %v40_v20 }
  0x9d   :  { %99 = vrsqrt.f32 %v38_v21 }
  0xa2   :  { %v94_v22 = vpop.eup %93 }
  0xa3   :  { %v96_v24 = vpop.eup %95  ;;  %v47_v25 = vmul.f32 %v94_v22, %v87_v2 }
  0xa4   :  { %v45_v26 = vmul.f32 %v96_v24, %v83_v3 }
  0xa5   :  { %v58_v27 = vmul.f32 %v80_v23, %v47_v25 }
  0xa6   :  { %v98_v28 = vpop.eup %97  ;;  %v56_v29 = vmul.f32 %v80_v23, %v45_v26 }
  0xa7   :  { %v100_v30 = vpop.eup %99  ;;  %62 = vst [vmem:[#allocation2 + $0x10] sm:$0xff] %v58_v27  ;;  %v48_v31 = vmul.f32 %v98_v28, %v88_v4 }
  0xa8   :  { %60 = vst [vmem:[#allocation2] sm:$0xff] %v56_v29  ;;  %v46_v32 = vmul.f32 %v100_v30, %v84_v5 }
  0xa9   :  { %v59_v33 = vmul.f32 %v80_v23, %v48_v31 }
  0xaa   :  { %v57_v34 = vmul.f32 %v80_v23, %v46_v32 }
  0xab   :  { %63 = vst [vmem:[#allocation2 + $0x18] sm:$0xff] %v59_v33 }
  0xac   :  { %61 = vst [vmem:[#allocation2 + $0x8] sm:$0xff] %v57_v34 }
  0xad   :  { %112 = shalt.err (!%p109_p4)
}
  0xae   :  { %s113_s18 = scalar_lea.hbm %s166_s2, 512 }
  0xaf   :  { %p114_p5 = scmp.ne.s32.totalorder %s166_s2, %s113_s18  ;;  %p117_p6 = scmp.lt.u32.totalorder %s113_s18, %s166_s2 }
  0xb1   :  { %p119_p7 = pnand %p117_p6, %p114_p5 }
  0xb3   :  { %122 = shalt.err (!%p119_p7)
}
  0xb4   :  { %s126_s23 = smov 128   ;;  %s127_s24 = smov 8  }
  0xb5   :  { %75 = dma.vmem_to_hbm [thread:$0]  %s70_s15, 512, %s166_s2, [#allocation3], %s126_s23, %s126_s23, %s127_s24  }
  0xb6   :  { %123 = dma.done.wait [#allocation3], 512  }
  0xb7   :  { %124 = vsyncadd [#allocation3], 4294966784 }
  0xb8   :  { %79 = vsyncpa [#allocation3], 1 }

// kernel: t5_encoder_wrapper_forward.15
= control target key start
LH: loop header
LB: loop body
LE: loop exit
PB: predicated region body
PF: predicated region fallthrough
CT: control target
= control target key end

     0   :  { %s485_s1 = inlined_call_operand.vmem [shape: bf16[256,128], index: 1, kind: input, shape index: {}]   ;;  %s486_s0 = inlined_call_operand.vmem [shape: bf16[32,256], index: 0, kind: input, shape index: {}]   ;;  %s487_s2 = inlined_call_operand.vmem [shape: bf16[32,128], index: 2, kind: input, shape index: {}]   ;;  %s488_s3 = inlined_call_operand.vmem [shape: bf16[32,128], index: 3, kind: output, shape index: {}]  }
   0x1   :  { %v371_v0 = vld [vmem:[%s485_s1 + $0x40] sm:$0xff]   ;;  %v373_v2 = vld [vmem:[%s485_s1 + $0x48] sm:$0xff]   ;;  %v375_v4 = vld [vmem:[%s485_s1 + $0x50] sm:$0xff]  }
   0x2   :  { %v372_v1 = vld [vmem:[%s485_s1] sm:$0xff]   ;;  %327 = vmatprep.subr.bf16.mxu0 %v371_v0  ;;  %355 = vmatprep.subr.bf16.mxu1 %v371_v0  ;;  %v374_v3 = vld [vmem:[%s485_s1 + $0x8] sm:$0xff]   ;;  %v376_v5 = vld [vmem:[%s485_s1 + $0x10] sm:$0xff]  }
   0x3   :  { %328 = vmatpush3.bf16.msra.mxu0 %v372_v1  ;;  %363 = vmatpush3.bf16.msra.mxu1 %v372_v1  ;;  %v377_v6 = vld [vmem:[%s485_s1 + $0x58] sm:$0xff]   ;;  %v379_v8 = vld [vmem:[%s485_s1 + $0x60] sm:$0xff]   ;;  %v381_v10 = vld [vmem:[%s485_s1 + $0x68] sm:$0xff]  }
   0x4   :  { %329 = vmatprep.subr.bf16.mxu0 %v373_v2  ;;  %356 = vmatprep.subr.bf16.mxu1 %v373_v2  ;;  %v378_v7 = vld [vmem:[%s485_s1 + $0x18] sm:$0xff]   ;;  %v380_v9 = vld [vmem:[%s485_s1 + $0x20] sm:$0xff]   ;;  %v382_v13 = vld [vmem:[%s485_s1 + $0x28] sm:$0xff]  }
   0x5   :  { %v389_v11 = vld [vmem:[%s486_s0 + $0x4] ss:$8 sps:$4 sm:$0xff]   ;;  %v392_v12 = vld [vmem:[%s486_s0 + $0x14] ss:$8 sps:$4 sm:$0xff]   ;;  %v387_v18 = vld [vmem:[%s486_s0] ss:$8 sps:$4 sm:$0xff]  }
   0x6   :  { %v383_v14 = vld [vmem:[%s485_s1 + $0x70] sm:$0xff]   ;;  %211 = vmatprep.mubr.bf16.mxu0 %v389_v11  ;;  %219 = vmatprep.mubr.bf16.mxu1 %v392_v12  ;;  %v385_v16 = vld [vmem:[%s485_s1 + $0x78] sm:$0xff]   ;;  %v308_v20 = vld [vmem:[%s487_s2] sm:$0xff]  }
   0x7   :  { %330 = vmatpush3.bf16.msra.mxu0 %v374_v3  ;;  %364 = vmatpush3.bf16.msra.mxu1 %v374_v3  ;;  %v384_v15 = vld [vmem:[%s485_s1 + $0x30] sm:$0xff]   ;;  %v386_v17 = vld [vmem:[%s485_s1 + $0x38] sm:$0xff]   ;;  %v325_v21 = vld [vmem:[%s487_s2 + $0x8] sm:$0xff]   ;;  %v309_v25 = vunpack.c.l.bf16 %v308_v20  ;;  %v310_v32 = vunpack.c.h.bf16 %v308_v20 }
   0x8   :  { %331 = vmatprep.subr.bf16.mxu0 %v375_v4  ;;  %357 = vmatprep.subr.bf16.mxu1 %v375_v4  ;;  %v390_v19 = vld [vmem:[%s486_s0 + $0x10] ss:$8 sps:$4 sm:$0xff]   ;;  %v313_v27 = vunpack.c.l.bf16 %v325_v21  ;;  %v314_v33 = vunpack.c.h.bf16 %v325_v21 }
   0xb   :  { %332 = vmatpush3.bf16.msra.mxu0 %v376_v5  ;;  %365 = vmatpush3.bf16.msra.mxu1 %v376_v5 }
   0xc   :  { %333 = vmatprep.subr.bf16.mxu0 %v377_v6  ;;  %358 = vmatprep.subr.bf16.mxu1 %v377_v6 }
   0xf   :  { %334 = vmatpush3.bf16.msra.mxu0 %v378_v7  ;;  %366 = vmatpush3.bf16.msra.mxu1 %v378_v7 }
  0x10   :  { %335 = vmatprep.subr.bf16.mxu0 %v379_v8  ;;  %359 = vmatprep.subr.bf16.mxu1 %v379_v8 }
  0x13   :  { %336 = vmatpush3.bf16.msra.mxu0 %v380_v9  ;;  %367 = vmatpush3.bf16.msra.mxu1 %v380_v9 }
  0x14   :  { %337 = vmatprep.subr.bf16.mxu0 %v381_v10  ;;  %360 = vmatprep.subr.bf16.mxu1 %v381_v10 }
  0x17   :  { %338 = vmatpush3.bf16.msra.mxu0 %v382_v13  ;;  %368 = vmatpush3.bf16.msra.mxu1 %v382_v13 }
  0x18   :  { %339 = vmatprep.subr.bf16.mxu0 %v383_v14  ;;  %361 = vmatprep.subr.bf16.mxu1 %v383_v14 }
  0x1b   :  { %340 = vmatpush3.bf16.msra.mxu0 %v384_v15  ;;  %369 = vmatpush3.bf16.msra.mxu1 %v384_v15 }
  0x1c   :  { %341 = vmatprep.subr.bf16.mxu0 %v385_v16  ;;  %362 = vmatprep.subr.bf16.mxu1 %v385_v16 }
  0x1f   :  { %342 = vmatpush3.bf16.msra.mxu0 %v386_v17  ;;  %370 = vmatpush3.bf16.msra.mxu1 %v386_v17 }
  0x22   :  { %212 = vmatmul.mubr.bf16.vlgmr.msra.gmra.mrb[0].mxu0 %v387_v18  ;;  %220 = vmatmul.mubr.bf16.vlgmr.msra.gmra.mrb[0].mxu1 %v390_v19 }
  0xf5   :  { %v343_v22 = vpop.f32.mrb[0].mxu0  ;;  %v349_v23 = vpop.f32.mrb[0].mxu1 }
  0xf6   :  { %v344_v24 = vpop.f32.mrb[1].mxu0  ;;  %v350_v26 = vpop.f32.mrb[1].mxu1 }
  0xf7   :  { %v345_v28 = vadd.f32 %v344_v24, %v343_v22  ;;  %v351_v29 = vadd.f32 %v350_v26, %v349_v23  ;;  %v346_v30 = vpop.f32.mrb[2].mxu0  ;;  %v352_v31 = vpop.f32.mrb[2].mxu1 }
  0xf8   :  { %v347_v34 = vpop.f32.mrb[3].mxu0  ;;  %v353_v35 = vpop.f32.mrb[3].mxu1 }
  0xf9   :  { %v348_v36 = vadd.f32 %v347_v34, %v346_v30  ;;  %v354_v37 = vadd.f32 %v353_v35, %v352_v31  ;;  %v251_v38 = vadd.f32 %v345_v28, %v309_v25  ;;  %v253_v39 = vadd.f32 %v351_v29, %v313_v27 }
  0xfb   :  { %v252_v40 = vadd.f32 %v348_v36, %v310_v32  ;;  %v254_v41 = vadd.f32 %v354_v37, %v314_v33 }
  0xfd   :  { %v318_v42 = vpack.c.bf16 %v252_v40, %v251_v38  ;;  %v323_v43 = vpack.c.bf16 %v254_v41, %v253_v39 }
  0xff   :  { %319 = vst [vmem:[%s488_s3] sm:$0xff] %v318_v42   ;;  %326 = vst [vmem:[%s488_s3 + $0x8] sm:$0xff] %v323_v43  }

</bundles_post_ra>
